<compile_context>
chip_gen: v6e
topology: v6e:2x2x1
jax: 0.10.0
libtpu: 0.0.40
codegen_flags: <defaults>
</compile_context>

<pallas_src>
import functools

import jax
import jax.numpy as jnp
from jax import lax
from jax.experimental import pallas as pl
from jax.experimental.pallas import tpu as pltpu

IMG_HEIGHT = 256
IMG_WIDTH = 256


def _div_const(a, d):
    # integer divide by a static positive constant (shift when power of two).
    if d & (d - 1) == 0:
        return jnp.right_shift(a, d.bit_length() - 1)
    return a // d


def _mod_const(a, d):
    if d & (d - 1) == 0:
        return jnp.bitwise_and(a, d - 1)
    return a % d


def _bitmask_kernel(x_ref, w_ref, o_ref, *, W, Fh, Fw, m_rank):
    """One sample: 1x1 conv -> exact lower-median threshold -> Fh x Fw replication."""
    x = x_ref[0]                                  # (C, P), P = H*W flattened row-major
    P = x.shape[1]
    OH, OW = o_ref.shape[1], o_ref.shape[2]

    # ---- 1x1 conv, no bias (MXU). Only row 0 of w_ref holds real weights. ----
    y8 = jnp.dot(w_ref[...], x, preferred_element_type=jnp.float32)   # (8, P)
    y_row = y8[0:1, :]                                                # (1, P)

    # ---- column orientation of y (P, 1) without a transpose: masked lane-reduce ----
    ri = lax.broadcasted_iota(jnp.int32, (P, P), 0)
    ci = lax.broadcasted_iota(jnp.int32, (P, P), 1)
    eye = ri == ci
    y_col = jnp.sum(jnp.where(eye, y_row, 0.0), axis=1, keepdims=True)   # (P, 1)

    # ---- exact lower median (torch.median) via rank counting ----
    # counts[i] = #{ j : y_j <= y_i };  median = min{ y_i : counts[i] >= m_rank+1 }
    le = (y_row <= y_col).astype(jnp.float32)        # (P, P), le[i, j] = [y_j <= y_i]
    counts = jnp.sum(le, axis=1, keepdims=True)      # (P, 1)
    need = jnp.float32(m_rank + 1)
    cand = jnp.where(counts >= need, y_col, jnp.inf)
    med = jnp.min(cand, axis=0, keepdims=True)       # (1, 1)

    # ---- binarize: > median -> 1.0, <= median -> 0.0 ----
    bin_row = (y_row > med).astype(jnp.float32)      # (1, P)

    # ---- 'area' upsample with integer factors == replication, as one MXU matmul:
    #      out[i, j] = bin[(i // Fh) * W + (j // Fw)]
    oi = lax.broadcasted_iota(jnp.int32, (OH, P), 0)
    pi = lax.broadcasted_iota(jnp.int32, (OH, P), 1)
    Lm = (_div_const(pi, W) == _div_const(oi, Fh)).astype(jnp.float32)   # (OH, P)
    pj = lax.broadcasted_iota(jnp.int32, (P, OW), 0)
    oj = lax.broadcasted_iota(jnp.int32, (P, OW), 1)
    Rm = (_mod_const(pj, W) == _div_const(oj, Fw)).astype(jnp.float32)   # (P, OW)

    o_ref[0] = jnp.dot(Lm * bin_row, Rm, preferred_element_type=jnp.float32)


def build_bitmask_forward(x, weight, *, out_hw=(IMG_HEIGHT, IMG_WIDTH)):
    """x: (N, C, H, W) f32; weight: (1, C, 1, 1) f32 (Conv2d 1x1, bias=False)."""
    n, c, h, w = x.shape
    oc = weight.shape[0]
    assert oc == 1, "Build_bitmask uses out=1"
    assert n == 8, "Build_bitmask's forward hard-codes .view(8, -1) (batch of 8)"
    out_h, out_w = out_hw
    # TODO(synk): non-integer-scale 'area' interpolation (fractional coverage) not implemented.
    assert out_h % h == 0 and out_w % w == 0
    fh, fw = out_h // h, out_w // w
    p = h * w

    x_cp = x.reshape(n, c, p).astype(jnp.float32)               # pure reshape of NCHW
    w_row = weight.reshape(oc, c).astype(jnp.float32)
    w_pad = jnp.zeros((8, c), jnp.float32).at[0:oc].set(w_row)  # full sublane-tile LHS

    m_rank = (oc * p - 1) // 2                                  # torch lower-median index

    kern = functools.partial(_bitmask_kernel, W=w, Fh=fh, Fw=fw, m_rank=m_rank)
    out = pl.pallas_call(
        kern,
        out_shape=jax.ShapeDtypeStruct((n, out_h, out_w), jnp.float32),
        grid=(n,),
        in_specs=[
            pl.BlockSpec((1, c, p), lambda i: (i, 0, 0)),   # one sample's activations
            pl.BlockSpec((8, c), lambda i: (0, 0)),         # weights (constant over grid)
        ],
        out_specs=pl.BlockSpec((1, out_h, out_w), lambda i: (i, 0, 0)),
        compiler_params=pltpu.CompilerParams(dimension_semantics=("parallel",)),
    )(x_cp, w_pad)
    return out.reshape(n, 1, out_h, out_w)


# ---------------------------------------------------------------------------
# Pure-JAX reference (correctness check)
# ---------------------------------------------------------------------------
def _ref_forward(x, weight, out_hw=(IMG_HEIGHT, IMG_WIDTH)):
    n, c, h, w = x.shape
    y = lax.conv_general_dilated(
        x, weight, (1, 1), "VALID", dimension_numbers=("NCHW", "OIHW", "NCHW"))
    flat = y.reshape(8, -1)
    m = (flat.shape[1] - 1) // 2
    med = jnp.sort(flat, axis=1)[:, m]                         # torch lower median
    b = jnp.where(y > med.reshape(8, 1, 1, 1), 1.0, 0.0)
    fh, fw = out_hw[0] // h, out_hw[1] // w
    return jnp.repeat(jnp.repeat(b, fh, axis=2), fw, axis=3)   # 'area' @ integer scale


if __name__ == "__main__":
    key = jax.random.PRNGKey(0)
    kx, kw = jax.random.split(key)
    # Module-consistent shapes: batch=8 (required by .view(8,-1)), channel=128 (default),
    # 16x16 feature map -> fixed 256x256 output.
    x = jax.random.normal(kx, (8, 128, 16, 16), jnp.float32)
    weight = 0.1 * jax.random.normal(kw, (1, 128, 1, 1), jnp.float32)

    out = build_bitmask_forward(x, weight)
    jax.block_until_ready(out)

    ref = _ref_forward(x, weight)
    assert out.shape == (8, 1, IMG_HEIGHT, IMG_WIDTH)
    mismatch = float(jnp.mean(jnp.abs(out - ref)))   # binary maps should agree
    assert mismatch <= 1e-3, f"binary-map mismatch fraction {mismatch}"

    print("KERNEL_OK")
</pallas_src>

<mosaic_0001>
module attributes {stable_mosaic.version = 11 : i64} {
  func.func @_bitmask_kernel(%arg0: i32, %arg1: memref<1x128x256xf32, #tpu.memory_space<vmem>>, %arg2: memref<8x128xf32, #tpu.memory_space<vmem>>, %arg3: memref<1x256x256xf32, #tpu.memory_space<vmem>>) attributes {dimension_semantics = [#tpu.dimension_semantics<parallel>], iteration_bounds = array<i64: 8>, scalar_prefetch = 0 : i64, scratch_operands = 0 : i64, tpu.core_type = #tpu.core_type<tc>, window_params = [{transform_indices = @transform_0, window_bounds = array<i64: 1, 128, 256>}, {pipeline_mode = #tpu.pipeline_mode<synchronous>, transform_indices = @transform_1, window_bounds = array<i64: 8, 128>}, {transform_indices = @transform_2, window_bounds = array<i64: 1, 256, 256>}]} {
    %c0 = arith.constant 0 : index
    %c0_0 = arith.constant 0 : index
    %c0_1 = arith.constant 0 : index
    %0 = vector.load %arg1[%c0, %c0_0, %c0_1] : memref<1x128x256xf32, #tpu.memory_space<vmem>>, vector<1x128x256xf32>
    %1 = vector.shape_cast %0 : vector<1x128x256xf32> to vector<128x256xf32>
    %c0_2 = arith.constant 0 : index
    %c0_3 = arith.constant 0 : index
    %2 = vector.load %arg2[%c0_2, %c0_3] : memref<8x128xf32, #tpu.memory_space<vmem>>, vector<8x128xf32>
    %cst = arith.constant dense<0.000000e+00> : vector<8x256xf32>
    %3 = tpu.matmul %2, %1, %cst {dimension_numbers = #tpu.dot_dimension_numbers<[1], [0], [0], [1], [0, 0, 1, 1], [], []>} : vector<8x128xf32>, vector<128x256xf32>, vector<8x256xf32> -> vector<8x256xf32>
    %4 = vector.extract_strided_slice %3 {offsets = [0, 0], sizes = [1, 256], strides = [1, 1]} : vector<8x256xf32> to vector<1x256xf32>
    %5 = tpu.iota {dimensions = array<i32: 0>} : vector<256x256xi32>
    %6 = tpu.iota {dimensions = array<i32: 1>} : vector<256x256xi32>
    %7 = arith.cmpi eq, %5, %6 : vector<256x256xi32>
    %cst_4 = arith.constant 0.000000e+00 : f32
    %8 = vector.shape_cast %4 : vector<1x256xf32> to vector<1x256xf32>
    %9 = vector.broadcast %8 : vector<1x256xf32> to vector<256x256xf32>
    %10 = vector.broadcast %cst_4 : f32 to vector<256x256xf32>
    %11 = arith.select %7, %9, %10 : vector<256x256xi1>, vector<256x256xf32>
    %cst_5 = arith.constant dense<0.000000e+00> : vector<256xf32>
    %12 = vector.multi_reduction <add>, %11, %cst_5 [1] : vector<256x256xf32> to vector<256xf32>
    %13 = vector.shape_cast %12 : vector<256xf32> to vector<256x1xf32>
    %14 = vector.broadcast %4 : vector<1x256xf32> to vector<256x256xf32>
    %15 = vector.broadcast %13 : vector<256x1xf32> to vector<256x256xf32>
    %16 = arith.cmpf ole, %14, %15 : vector<256x256xf32>
    %17 = arith.extui %16 : vector<256x256xi1> to vector<256x256xi32>
    %18 = arith.sitofp %17 : vector<256x256xi32> to vector<256x256xf32>
    %cst_6 = arith.constant dense<0.000000e+00> : vector<256xf32>
    %19 = vector.multi_reduction <add>, %18, %cst_6 [1] : vector<256x256xf32> to vector<256xf32>
    %20 = vector.shape_cast %19 : vector<256xf32> to vector<256x1xf32>
    %cst_7 = arith.constant 1.280000e+02 : f32
    %21 = vector.broadcast %cst_7 : f32 to vector<256x1xf32>
    %22 = arith.cmpf oge, %20, %21 : vector<256x1xf32>
    %cst_8 = arith.constant 0x7F800000 : f32
    %23 = vector.broadcast %cst_8 : f32 to vector<256x1xf32>
    %24 = arith.select %22, %13, %23 : vector<256x1xi1>, vector<256x1xf32>
    %cst_9 = arith.constant dense<0x7F800000> : vector<1xf32>
    %25 = vector.multi_reduction <minimumf>, %24, %cst_9 [0] : vector<256x1xf32> to vector<1xf32>
    %26 = vector.shape_cast %25 : vector<1xf32> to vector<1x1xf32>
    %27 = vector.broadcast %26 : vector<1x1xf32> to vector<1x256xf32>
    %28 = arith.cmpf ogt, %4, %27 : vector<1x256xf32>
    %29 = arith.extui %28 : vector<1x256xi1> to vector<1x256xi32>
    %30 = arith.sitofp %29 : vector<1x256xi32> to vector<1x256xf32>
    %31 = tpu.iota {dimensions = array<i32: 0>} : vector<256x256xi32>
    %32 = tpu.iota {dimensions = array<i32: 1>} : vector<256x256xi32>
    %c4_i32 = arith.constant 4 : i32
    %33 = vector.broadcast %c4_i32 : i32 to vector<256x256xi32>
    %34 = arith.shrsi %32, %33 : vector<256x256xi32>
    %c4_i32_10 = arith.constant 4 : i32
    %35 = vector.broadcast %c4_i32_10 : i32 to vector<256x256xi32>
    %36 = arith.shrsi %31, %35 : vector<256x256xi32>
    %37 = arith.cmpi eq, %34, %36 : vector<256x256xi32>
    %38 = arith.extui %37 : vector<256x256xi1> to vector<256x256xi32>
    %39 = arith.sitofp %38 : vector<256x256xi32> to vector<256x256xf32>
    %40 = tpu.iota {dimensions = array<i32: 0>} : vector<256x256xi32>
    %41 = tpu.iota {dimensions = array<i32: 1>} : vector<256x256xi32>
    %c15_i32 = arith.constant 15 : i32
    %42 = vector.broadcast %c15_i32 : i32 to vector<256x256xi32>
    %43 = arith.andi %40, %42 : vector<256x256xi32>
    %c4_i32_11 = arith.constant 4 : i32
    %44 = vector.broadcast %c4_i32_11 : i32 to vector<256x256xi32>
    %45 = arith.shrsi %41, %44 : vector<256x256xi32>
    %46 = arith.cmpi eq, %43, %45 : vector<256x256xi32>
    %47 = arith.extui %46 : vector<256x256xi1> to vector<256x256xi32>
    %48 = arith.sitofp %47 : vector<256x256xi32> to vector<256x256xf32>
    %49 = vector.broadcast %30 : vector<1x256xf32> to vector<256x256xf32>
    %50 = arith.mulf %39, %49 : vector<256x256xf32>
    %cst_12 = arith.constant dense<0.000000e+00> : vector<256x256xf32>
    %51 = tpu.matmul %50, %48, %cst_12 {dimension_numbers = #tpu.dot_dimension_numbers<[1], [0], [0], [1], [0, 0, 1, 1], [], []>} : vector<256x256xf32>, vector<256x256xf32>, vector<256x256xf32> -> vector<256x256xf32>
    %c0_13 = arith.constant 0 : index
    %c0_14 = arith.constant 0 : index
    %c0_15 = arith.constant 0 : index
    %52 = vector.load %arg3[%c0_13, %c0_14, %c0_15] : memref<1x256x256xf32, #tpu.memory_space<vmem>>, vector<1x256x256xf32>
    %53 = vector.shape_cast %52 : vector<1x256x256xf32> to vector<256x256xf32>
    %54 = vector.shape_cast %51 : vector<256x256xf32> to vector<1x256x256xf32>
    tpu.vector_store %arg3[%c0_13, %c0_14, %c0_15], %54 {strides = array<i32>} : memref<1x256x256xf32, #tpu.memory_space<vmem>>, vector<1x256x256xf32>,
    return
  }
  func.func @transform_0(%arg0: i32) -> (i32, i32, i32) {
    %c0_i32 = arith.constant 0 : i32
    %c0_i32_0 = arith.constant 0 : i32
    %c0_i32_1 = arith.constant 0 : i32
    return %arg0, %c0_i32, %c0_i32_0 : i32, i32, i32
  }
  func.func @transform_1(%arg0: i32) -> (i32, i32) {
    %c0_i32 = arith.constant 0 : i32
    %c0_i32_0 = arith.constant 0 : i32
    %c0_i32_1 = arith.constant 0 : i32
    return %c0_i32, %c0_i32_0 : i32, i32
  }
  func.func @transform_2(%arg0: i32) -> (i32, i32, i32) {
    %c0_i32 = arith.constant 0 : i32
    %c0_i32_0 = arith.constant 0 : i32
    %c0_i32_1 = arith.constant 0 : i32
    return %arg0, %c0_i32, %c0_i32_0 : i32, i32, i32
  }
}

</mosaic_0001>

<bundles_post_ra>
// kernel: tpu_custom_call.1
= control target key start
LH: loop header
LB: loop body
LE: loop exit
PB: predicated region body
PF: predicated region fallthrough
CT: control target
= control target key end

     0   :  { %7 = vsyncpa [#allocation3], 0  ;;  %s3784_s0 = inlined_call_operand.hbm [shape: f32[8,128,256], index: 0, kind: input, shape index: {}]   ;;  %s3785_s1 = inlined_call_operand.hbm [shape: f32[8,128], index: 1, kind: input, shape index: {}]   ;;  %s3786_s2 = inlined_call_operand.hbm [shape: f32[8,256,256], index: 2, kind: output, shape index: {}]  }
   0x1   :  { %9 = vsyncpa [#allocation3 + $0x1], 0 }
   0x2   :  { %10 = vsyncpa [#allocation6], 0 }
   0x3   :  { %11 = vsyncpa [#allocation4], 0 }
   0x4   :  { %13 = vsyncpa [#allocation4 + $0x1], 0  ;;  %s2433_s9 = smov 0   ;;  %s2435_s10 = smov 0  }
   0x5   :  { %s2437_s11 = smov 0   ;;  %s2439_s12 = smov 0  }
   0x6 LB: > { %s2454_s13 = sadd.s32 4294967295, %s2407_s12   ;;  %s1882_s14 = sadd.s32 4294967294, %s2407_s12   ;;  %s2407_s12 = sphi %s2439_s12, %s3939_s12   ;;  %s2403_s11 = sphi %s2437_s11, %s3938_s11   ;;  %s2399_s10 = sphi %s2435_s10, %s3937_s10   ;;  %s2395_s9 = sphi %s2433_s9, %s3936_s9  }
   0x7   : > { %s2458_s15 = sadd.s32 1, %s2407_s12   ;;  %s26_s16 = sadd.s32 1, %s2403_s11 }
   0x8   : > { %s23_s17 = ssub.s32 %s2407_s12, %s2458_s15  ;;  %p33_p0 = scmp.ne.s32.totalorder %s2403_s11, %s2399_s10 }
   0x9   : > { %p24_p1 = scmp.eq.s32.totalorder %s23_s17, 0  ;;  %p34_p2 = scmp.eq.s32.totalorder %s2407_s12, 0 }
   0xa   : > { %p39_p3 = scmp.ne.s32.totalorder %s2399_s10, %s2395_s9  ;;  %p3788_p4 = scmp.eq.s32.totalorder %s2454_s13, 0 }
   0xb   : > { %s2470_s18 = scalar_select %p24_p1, %s2403_s11, %s26_s16  }
   0xc   : > { %p2472_p5 = por %p34_p2, %p33_p0  ;;  %p2478_p6 = por %p3788_p4, %p39_p3 }
   0xd   : > { %p84_p7 = scmp.eq.s32.totalorder %s2454_s13, 7  ;;  %p90_p8 = scmp.eq.s32.totalorder %s1882_s14, 7 }
   0xe   : > { %s3830_s20 = scalar_select %p2478_p6, 1, 0 }
   0xf   : > { %p1883_p9 = scmp.ge.s32.totalorder %s2407_s12, 1  ;;  %p97_p10 = scmp.lt.s32.totalorder %s2407_s12, 9 }
  0x10   : > { %p2485_p11 = por %p84_p7, %p33_p0  ;;  %p2489_p12 = por %p90_p8, %p39_p3 }
  0x11   : > { %p2493_p13 = pnand %p1883_p9, %p97_p10  ;;  %s2409_s24 = smov [#allocation5]  }
  0x12   : > { %s3831_s21 = scalar_select %p2485_p11, 1, 0 }
  0x13   : > { %s3832_s22 = scalar_select %p2489_p12, 1, 0 }
  0x14   : > { %s3833_s23 = scalar_select %p2493_p13, 1, 0 }
  0x15   : > { %p2230_p1 = pneg %p2493_p13  ;;  %s110_s25 = sshll.u32 %s2409_s24, 4  ;;  %s111_s25 = int_to_ptr.vmem [resolvable:$true] %s110_s25 }
  0x16   : > { %p2243_p2 = scmp.lt.s32.totalorder %s2407_s12, 8  ;;  %s121_s27 = sand.u32 1, %s2403_s11  }
  0x17   : > { %p2502_p0 = pnand %p2230_p1, %p3788_p4  ;;  %s1886_s29 = sshll.u32 %s121_s27, 8 }
  0x18   : > { %p2509_p3 = pnand %p2243_p2, %p2472_p5  ;;  %s2296_s30 = scalar_lea.vmem %s111_s25, 128 }
  0x19   : > { %p2287_p7 = pneg %p2502_p0  ;;  %p2297_p8 = scmp.ne.s32.totalorder %s111_s25, %s2296_s30 }
  0x1a   : > { %p2304_p12 = scmp.lt.s32.totalorder %s111_s25, %s111_s25  ;;  %p2305_p11 = scmp.lt.s32.totalorder %s2296_s30, %s2296_s30 }
  0x1b   : > { %p2299_p9 = pnand %p2297_p8, %p2287_p7 }
  0x1c   : > { %p2306_p1 = por %p2305_p11, %p2304_p12 }
  0x1d   : > { %p2300_p10 = pneg %p2299_p9 }
  0x1f   : > { %p2307_p4 = pnand %p2306_p1, %p2300_p10 }
  0x21   : > { %2310 = shalt.err (!%p2307_p4)
}
  0x22   : > { %2233 = dma.hbm_to_vmem [thread:$0]  (!%p2502_p0), %s3785_s1, 128, %s111_s25, [#allocation6]  }
  0x23   : > { %s2156_s5 = sshll.u32 %s2407_s12, 12  ;;  %s125_s6 = scalar_lea.vmem [#allocation2], %s1886_s29 }
  0x24   : > { %s132_s7 = sshll.u32 %s125_s6, 4  ;;  %s2524_s16 = scalar_lea.hbm %s3784_s0, %s2156_s5  ;;  %s2526_s7 = int_to_ptr.vmem [resolvable:$true] %s132_s7 }
  0x25   : > { %s2528_s17 = scalar_lea.sflag [#allocation3], %s121_s27  ;;  %s2311_s19 = scalar_lea.hbm %s2524_s16, 4096 }
  0x26   : > { %p2312_p4 = scmp.ne.s32.totalorder %s2524_s16, %s2311_s19  ;;  %p2313_p5 = pneg %p2509_p3 }
  0x27   : > { %s2316_s26 = scalar_lea.hbm %s3784_s0, 32768  ;;  %p2317_p2 = scmp.lt.s32.totalorder %s2524_s16, %s3784_s0 }
  0x28   : > { %p2314_p11 = pnand %p2313_p5, %p2312_p4  ;;  %p2318_p0 = scmp.lt.s32.totalorder %s2316_s26, %s2311_s19 }
  0x2a   : > { %p2315_p12 = pneg %p2314_p11  ;;  %p2319_p7 = por %p2318_p0, %p2317_p2 }
  0x2c   : > { %p2320_p8 = pnand %p2319_p7, %p2315_p12 }
  0x2e   : > { %2323 = shalt.err (!%p2320_p8)
}
  0x2f   : > { %s2324_s27 = scalar_lea.vmem %s2526_s7, 4096  ;;  %s2410_s3 = smov [#allocation2]  }
  0x30   : > { %p2325_p9 = scmp.ne.s32.totalorder %s2526_s7, %s2324_s27  ;;  %s2329_s4 = sshll.u32 %s2410_s3, 4  ;;  %s2330_s4 = int_to_ptr.vmem [resolvable:$false] %s2329_s4 }
  0x31   : > { %s2331_s5 = scalar_lea.vmem %s2330_s4, 8192  ;;  %p2332_p4 = scmp.lt.s32.totalorder %s2526_s7, %s2330_s4 }
  0x32   : > { %p2327_p10 = pnand %p2325_p9, %p2313_p5  ;;  %p2333_p11 = scmp.lt.s32.totalorder %s2331_s5, %s2324_s27 }
  0x34   : > { %p2328_p1 = pneg %p2327_p10  ;;  %p2334_p6 = por %p2333_p11, %p2332_p4 }
  0x36   : > { %p2335_p13 = pnand %p2334_p6, %p2328_p1 }
  0x38   : > { %2338 = shalt.err (!%p2335_p13)
}
  0x39   : > { %s2411_s6 = smov 256   ;;  %s2412_s8 = smov 16  }
  0x3a   : > { %2237 = dma.hbm_to_vmem [thread:$0]  (!%p2509_p3), %s2524_s16, 4096, %s2526_s7, %s2528_s17, %s2411_s6, %s2411_s6, %s2412_s8  }
  0x3b   : > { %p3836_p5 = scmp.ne.s32.totalorder %s3833_s23, 0 }
  0x3d   : > { %144 = sbr.rel (%p3836_p5) target bundleno = 958 (0x3be), region = 28 }
  0x42   : > { %s2552_s14 = sand.u32 1, %s2399_s10   ;;  %p3837_p6 = scmp.ne.s32.totalorder %s3830_s20, 0 }
  0x43   : > { %s1890_s19 = sshll.u32 %s2552_s14, 8  ;;  %s147_s24 = scalar_lea.sflag [#allocation3], %s2552_s14 }
  0x44   : > { %s2556_s25 = scalar_lea.vmem [#allocation2], %s1890_s19 }
  0x45   : > { %2382 = dma.done.wait (%p3837_p6), %s147_s24, 4096  }
  0x46   : > { %2384 = vsyncadd (%p3837_p6), %s147_s24, 4294963200  ;;  %p3838_p13 = scmp.eq.s32.totalorder %s2454_s13, 0 }
  0x48   : > { %2386 = dma.done.wait (%p3838_p13), [#allocation6], 128   ;;  %p3839_p3 = pmov %p3838_p13 }
  0x49   : > { %v3806_v0 = vmov 0.0   ;;  %v206_v1 = vld [vmem:[%s2556_s25 + $0xf8] sm:$0xff]  ;;  %v205_v2 = vld [vmem:[%s2556_s25 + $0xf0] sm:$0xff]  ;;  %v204_v3 = vld [vmem:[%s2556_s25 + $0xe8] sm:$0xff]  ;;  %v279_v34 = vlaneseq  ;;  %s1892_s20 = sshll.u32 %s2552_s14, 9  ;;  %s2157_s28 = sshll.u32 %s2454_s13, 13 }
  0x4a   : > { %2388 = vsyncadd (%p3839_p3), [#allocation6], 4294967168  ;;  %272 = vmatprep.mubr.f32.mxu0 %v3806_v0  ;;  %208 = vmatprep.subr.mxu0 %v206_v1  ;;  %v203_v4 = vld [vmem:[%s2556_s25 + $0xe0] sm:$0xff]  ;;  %v202_v5 = vld [vmem:[%s2556_s25 + $0xd8] sm:$0xff]  ;;  %s3669_s23 = scalar_lea.vmem [#allocation7], %s1892_s20  ;;  %s3738_s26 = scalar_lea.hbm %s3786_s2, %s2157_s28 }
  0x4b   : > { %209 = vmatpush1.msra.mxu0 %v205_v2  ;;  %v201_v6 = vld [vmem:[%s2556_s25 + $0xd0] sm:$0xff]  ;;  %v200_v7 = vld [vmem:[%s2556_s25 + $0xc8] sm:$0xff]  ;;  %v199_v8 = vld [vmem:[%s2556_s25 + $0xc0] sm:$0xff]  ;;  %v2599_v35 = vshrl.u32 %v279_v34, 7  ;;  %v2604_v37 = vand.u32 127, %v279_v34  ;;  %s1799_s7 = sshll.u32 %s3669_s23, 4  ;;  %s3740_s7 = int_to_ptr.vmem [resolvable:$true] %s1799_s7 }
  0x4c   : > { %210 = vmatprep.subr.mxu0 %v204_v3  ;;  %v198_v9 = vld [vmem:[%s2556_s25 + $0xb8] sm:$0xff]  ;;  %v197_v10 = vld [vmem:[%s2556_s25 + $0xb0] sm:$0xff]  ;;  %v196_v11 = vld [vmem:[%s2556_s25 + $0xa8] sm:$0xff]  ;;  %s1786_s29 = scalar_lea.sflag [#allocation4], %s2552_s14  ;;  %s2339_s30 = scalar_lea.vmem %s3740_s7, 8192 }
  0x4d   : > { %211 = vmatpush1.msra.mxu0 %v203_v4  ;;  %v195_v12 = vld [vmem:[%s2556_s25 + $0xa0] sm:$0xff]  ;;  %v194_v13 = vld [vmem:[%s2556_s25 + $0x98] sm:$0xff]  ;;  %v193_v14 = vld [vmem:[%s2556_s25 + $0x90] sm:$0xff]  ;;  %v2602_v36 = vadd.s32 16, %v2599_v35  ;;  %v2607_v38 = vsub.s32 0, %v2599_v35  ;;  %vm315_vm1 = vcmp.eq.s32.totalorder %v2599_v35, %v2604_v37  ;;  %v2616_v40 = vadd.s32 24, %v2599_v35  ;;  %p2340_p12 = scmp.ne.s32.totalorder %s3740_s7, %s2339_s30 }
  0x4e   : > { %212 = vmatprep.subr.mxu0 %v202_v5  ;;  %v192_v15 = vld [vmem:[%s2556_s25 + $0x88] sm:$0xff]  ;;  %v191_v16 = vld [vmem:[%s2556_s25 + $0x80] sm:$0xff]  ;;  %v190_v17 = vld [vmem:[%s2556_s25 + $0x78] sm:$0xff]  ;;  %v2619_v41 = vadd.s32 8, %v2599_v35  ;;  %v2632_v45 = vadd.s32 40, %v2599_v35  ;;  %v2635_v46 = vadd.s32 32, %v2599_v35 }
  0x4f   : > { %213 = vmatpush1.msra.mxu0 %v201_v6  ;;  %v189_v18 = vld [vmem:[%s2556_s25 + $0x70] sm:$0xff]  ;;  %v188_v19 = vld [vmem:[%s2556_s25 + $0x68] sm:$0xff]  ;;  %v187_v20 = vld [vmem:[%s2556_s25 + $0x60] sm:$0xff]  ;;  %3840 = vst [vmem:[#allocation11_spill] sm:$0xff] %v2607_v38  ;;  %vm319_vm0 = vcmp.eq.s32.totalorder %v2602_v36, %v2604_v37  ;;  %vm321_vm2 = vcmp.eq.s32.totalorder %v2616_v40, %v2604_v37  ;;  %v2644_v49 = vadd.s32 56, %v2599_v35  ;;  %v2647_v50 = vadd.s32 48, %v2599_v35 }
  0x50   : > { %214 = vmatprep.subr.mxu0 %v200_v7  ;;  %v186_v21 = vld [vmem:[%s2556_s25 + $0x58] sm:$0xff]  ;;  %v185_v22 = vld [vmem:[%s2556_s25 + $0x50] sm:$0xff]  ;;  %v184_v23 = vld [vmem:[%s2556_s25 + $0x48] sm:$0xff]  ;;  %vm317_vm3 = vcmp.eq.s32.totalorder %v2619_v41, %v2604_v37  ;;  %vm325_vm4 = vcmp.eq.s32.totalorder %v2632_v45, %v2604_v37  ;;  %vm323_vm5 = vcmp.eq.s32.totalorder %v2635_v46, %v2604_v37  ;;  %v2656_v53 = vadd.s32 72, %v2599_v35  ;;  %p3934_p2 = scmp.ne.s32.totalorder %s3831_s21, 0  ;;  %s2415_s13 = smov [#allocation7]  }
  0x51   : > { %215 = vmatpush1.msra.mxu0 %v199_v8  ;;  %v183_v24 = vld [vmem:[%s2556_s25 + $0x40] sm:$0xff]  ;;  %v182_v25 = vld [vmem:[%s2556_s25 + $0x38] sm:$0xff]  ;;  %v181_v26 = vld [vmem:[%s2556_s25 + $0x30] sm:$0xff]  ;;  %vm329_vm6 = vcmp.eq.s32.totalorder %v2644_v49, %v2604_v37  ;;  %vm327_vm7 = vcmp.eq.s32.totalorder %v2647_v50, %v2604_v37  ;;  %v2659_v54 = vadd.s32 64, %v2599_v35  ;;  %v2668_v57 = vadd.s32 88, %v2599_v35  ;;  %s2343_s27 = sshll.u32 %s2415_s13, 4  ;;  %s2344_s27 = int_to_ptr.vmem [resolvable:$false] %s2343_s27 }
  0x52   : > { %216 = vmatprep.subr.mxu0 %v198_v9  ;;  %v180_v27 = vld [vmem:[%s2556_s25 + $0x28] sm:$0xff]  ;;  %v179_v28 = vld [vmem:[%s2556_s25 + $0x20] sm:$0xff]  ;;  %v178_v29 = vld [vmem:[%s2556_s25 + $0x18] sm:$0xff]  ;;  %3842 = vst [vmem:[#allocation13_spill] sm:$0xff] %v2656_v53  ;;  %vm333_vm8 = vcmp.eq.s32.totalorder %v2656_v53, %v2604_v37  ;;  %v2671_v58 = vadd.s32 80, %v2599_v35  ;;  %v2680_v61 = vadd.s32 104, %v2599_v35  ;;  %p2341_p0 = pnand %p2340_p12, %p3934_p2  ;;  %p2346_p8 = scmp.lt.s32.totalorder %s3740_s7, %s2344_s27 }
  0x53   : > { %217 = vmatpush1.msra.mxu0 %v197_v10  ;;  %v177_v30 = vld [vmem:[%s2556_s25 + $0x10] sm:$0xff]  ;;  %v176_v31 = vld [vmem:[%s2556_s25 + $0x8] sm:$0xff]  ;;  %v175_v32 = vld [vmem:[%s2556_s25] sm:$0xff]  ;;  %vm331_vm9 = vcmp.eq.s32.totalorder %v2659_v54, %v2604_v37  ;;  %3843 = vst [vmem:[#allocation14_spill] sm:$0xff] %v2668_v57  ;;  %vm337_vm10 = vcmp.eq.s32.totalorder %v2668_v57, %v2604_v37  ;;  %v2683_v62 = vadd.s32 96, %v2599_v35  ;;  %v2688_v2 = vadd.s32 120, %v2599_v35 }
  0x54   : > { %218 = vmatprep.subr.mxu0 %v196_v11  ;;  %v207_v33 = vld [vmem:[#allocation5] sm:$0xff]  ;;  %3844 = vst [vmem:[#allocation15_spill] sm:$0xff] %v2671_v58  ;;  %vm335_vm11 = vcmp.eq.s32.totalorder %v2671_v58, %v2604_v37  ;;  %3845 = vst [vmem:[#allocation16_spill] sm:$0xff] %v2680_v61  ;;  %vm341_vm12 = vcmp.eq.s32.totalorder %v2680_v61, %v2604_v37  ;;  %v2695_v3 = vadd.s32 112, %v2599_v35  ;;  %v2706_v7 = vadd.s32 136, %v2599_v35  ;;  %p2342_p7 = pneg %p2341_p0  ;;  %s2345_s3 = scalar_lea.vmem %s2344_s27, 16384 }
  0x55   : > { %219 = vmatpush1.msra.mxu0 %v195_v12  ;;  %3846 = vst [vmem:[#allocation17_spill] sm:$0xff] %v2683_v62  ;;  %3847 = vst [vmem:[#allocation18_spill] sm:$0xff] %v2688_v2  ;;  %vm339_vm13 = vcmp.eq.s32.totalorder %v2683_v62, %v2604_v37  ;;  %vm345_vm14 = vcmp.eq.s32.totalorder %v2688_v2, %v2604_v37  ;;  %v2709_v8 = vadd.s32 128, %v2604_v37  ;;  %v2712_v9 = vadd.s32 128, %v2599_v35  ;;  %p2347_p9 = scmp.lt.s32.totalorder %s2345_s3, %s2339_s30 }
  0x56   : > { %220 = vmatprep.subr.mxu0 %v194_v13  ;;  %3848 = vst [vmem:[#allocation19_spill] sm:$0xff] %v2695_v3  ;;  %vm343_vm15 = vcmp.eq.s32.totalorder %v2695_v3, %v2604_v37  ;;  %v2725_v13 = vadd.s32 152, %v2599_v35  ;;  %v2788_v34 = vadd.s32 224, %v2599_v35 }
  0x57   : > { %221 = vmatpush1.msra.mxu0 %v193_v14  ;;  %v2728_v14 = vadd.s32 144, %v2599_v35  ;;  %p2348_p10 = por %p2347_p9, %p2346_p8 }
  0x58   : > { %222 = vmatprep.subr.mxu0 %v192_v15  ;;  %3859 = vst [vmem:[#allocation30_spill] sm:$0xff] %v2788_v34 }
  0x59   : > { %223 = vmatpush1.msra.mxu0 %v191_v16  ;;  %p2349_p1 = pnand %p2348_p10, %p2342_p7 }
  0x5a   : > { %224 = vmatprep.subr.mxu0 %v190_v17  ;;  %v2737_v17 = vadd.s32 168, %v2599_v35 }
  0x5b   : > { %225 = vmatpush1.msra.mxu0 %v189_v18  ;;  %v2740_v18 = vadd.s32 160, %v2599_v35 }
  0x5c   : > { %226 = vmatprep.subr.mxu0 %v188_v19  ;;  %3850 = vst [vmem:[#allocation21_spill] sm:$0xff] %v2737_v17 }
  0x5d   : > { %227 = vmatpush1.msra.mxu0 %v187_v20  ;;  %3851 = vst [vmem:[#allocation22_spill] sm:$0xff] %v2740_v18 }
  0x5e   : > { %228 = vmatprep.subr.mxu0 %v186_v21  ;;  %v2749_v21 = vadd.s32 184, %v2599_v35 }
  0x5f   : > { %229 = vmatpush1.msra.mxu0 %v185_v22  ;;  %v2752_v22 = vadd.s32 176, %v2599_v35 }
  0x60   : > { %230 = vmatprep.subr.mxu0 %v184_v23  ;;  %3852 = vst [vmem:[#allocation23_spill] sm:$0xff] %v2749_v21 }
  0x61   : > { %231 = vmatpush1.msra.mxu0 %v183_v24  ;;  %3853 = vst [vmem:[#allocation24_spill] sm:$0xff] %v2752_v22 }
  0x62   : > { %232 = vmatprep.subr.mxu0 %v182_v25  ;;  %v2761_v25 = vadd.s32 200, %v2599_v35 }
  0x63   : > { %233 = vmatpush1.msra.mxu0 %v181_v26  ;;  %v2764_v26 = vadd.s32 192, %v2599_v35 }
  0x64   : > { %234 = vmatprep.subr.mxu0 %v180_v27  ;;  %3854 = vst [vmem:[#allocation25_spill] sm:$0xff] %v2761_v25 }
  0x65   : > { %235 = vmatpush1.msra.mxu0 %v179_v28  ;;  %3855 = vst [vmem:[#allocation26_spill] sm:$0xff] %v2764_v26 }
  0x66   : > { %236 = vmatprep.subr.mxu0 %v178_v29  ;;  %v2773_v29 = vadd.s32 216, %v2599_v35 }
  0x67   : > { %237 = vmatpush1.msra.mxu0 %v177_v30  ;;  %v2776_v30 = vadd.s32 208, %v2599_v35 }
  0x68   : > { %238 = vmatprep.subr.mxu0 %v176_v31  ;;  %3856 = vst [vmem:[#allocation27_spill] sm:$0xff] %v2773_v29 }
  0x69   : > { %239 = vmatpush1.msra.mxu0 %v175_v32  ;;  %3857 = vst [vmem:[#allocation28_spill] sm:$0xff] %v2776_v30 }
  0x6a   : > { %273 = vmatmul.mubr.f32.vlgmr.msra.gmra.mxu0 %v207_v33  ;;  %v2785_v33 = vadd.s32 232, %v2599_v35 }
  0x6c   : > { %3858 = vst [vmem:[#allocation29_spill] sm:$0xff] %v2785_v33 }
 0x12a   : > { %v2609_v39 = vpop.f32.mrf.mxu0 }
 0x12b   : > { %3841 = vst [vmem:[#allocation12_spill] sm:$0xff] %v2609_v39  ;;  %v2623_v42 = vrot.slane %v2609_v39, %v2607_v38 }
 0x12c   : > { %v2701_v6 = vpop.f32.mrf.mxu0 }
 0x12d   : > { %v391_v43 = vsel %vm319_vm0, %v2623_v42, 0.0  ;;  %v387_v44 = vsel %vm315_vm1, %v2623_v42, 0.0  ;;  %v393_v47 = vsel %vm321_vm2, %v2623_v42, 0.0  ;;  %v389_v48 = vsel %vm317_vm3, %v2623_v42, 0.0  ;;  %3849 = vst [vmem:[#allocation20_spill] sm:$0xff] %v2701_v6 }
 0x12e   : > { %458 = vadd.xlane.f32.xlu1 %v391_v43  ;;  %452 = vadd.xlane.f32.xlu0 %v387_v44  ;;  %v397_v51 = vsel %vm325_vm4, %v2623_v42, 0.0  ;;  %v395_v52 = vsel %vm323_vm5, %v2623_v42, 0.0  ;;  %v401_v55 = vsel %vm329_vm6, %v2623_v42, 0.0  ;;  %v399_v56 = vsel %vm327_vm7, %v2623_v42, 0.0 }
 0x12f   : > { %v405_v59 = vsel %vm333_vm8, %v2623_v42, 0.0  ;;  %v403_v60 = vsel %vm331_vm9, %v2623_v42, 0.0  ;;  %v409_v63 = vsel %vm337_vm10, %v2623_v42, 0.0  ;;  %v407_v1 = vsel %vm335_vm11, %v2623_v42, 0.0 }
 0x130   : > { %v413_v4 = vsel %vm341_vm12, %v2623_v42, 0.0  ;;  %v411_v5 = vsel %vm339_vm13, %v2623_v42, 0.0  ;;  %v2716_v10 = vrot.slane %v2701_v6, %v2607_v38  ;;  %v417_v11 = vsel %vm345_vm14, %v2623_v42, 0.0 }
 0x131   : > { %v415_v12 = vsel %vm343_vm15, %v2623_v42, 0.0  ;;  %vm350_vm0 = vcmp.eq.s32.totalorder %v2706_v7, %v2709_v8  ;;  %vm348_vm1 = vcmp.eq.s32.totalorder %v2712_v9, %v2709_v8  ;;  %vm354_vm2 = vcmp.eq.s32.totalorder %v2725_v13, %v2709_v8 }
 0x132   : > { %461 = vadd.xlane.f32.xlu1 %v393_v47  ;;  %455 = vadd.xlane.f32.xlu0 %v389_v48  ;;  %v422_v15 = vsel %vm350_vm0, %v2716_v10, 0.0  ;;  %v420_v16 = vsel %vm348_vm1, %v2716_v10, 0.0  ;;  %vm352_vm3 = vcmp.eq.s32.totalorder %v2728_v14, %v2709_v8  ;;  %v426_v19 = vsel %vm354_vm2, %v2716_v10, 0.0 }
 0x133   : > { %v424_v20 = vsel %vm352_vm3, %v2716_v10, 0.0  ;;  %vm358_vm4 = vcmp.eq.s32.totalorder %v2737_v17, %v2709_v8  ;;  %vm356_vm5 = vcmp.eq.s32.totalorder %v2740_v18, %v2709_v8  ;;  %vm362_vm6 = vcmp.eq.s32.totalorder %v2749_v21, %v2709_v8 }
 0x134   : > { %v430_v23 = vsel %vm358_vm4, %v2716_v10, 0.0  ;;  %v428_v24 = vsel %vm356_vm5, %v2716_v10, 0.0  ;;  %vm360_vm7 = vcmp.eq.s32.totalorder %v2752_v22, %v2709_v8  ;;  %v434_v27 = vsel %vm362_vm6, %v2716_v10, 0.0 }
 0x135   : > { %v432_v28 = vsel %vm360_vm7, %v2716_v10, 0.0  ;;  %vm366_vm8 = vcmp.eq.s32.totalorder %v2761_v25, %v2709_v8  ;;  %vm364_vm9 = vcmp.eq.s32.totalorder %v2764_v26, %v2709_v8  ;;  %vm370_vm10 = vcmp.eq.s32.totalorder %v2773_v29, %v2709_v8 }
 0x136   : > { %467 = vadd.xlane.f32.xlu1 %v397_v51  ;;  %464 = vadd.xlane.f32.xlu0 %v395_v52  ;;  %v438_v31 = vsel %vm366_vm8, %v2716_v10, 0.0  ;;  %v436_v32 = vsel %vm364_vm9, %v2716_v10, 0.0  ;;  %vm368_vm11 = vcmp.eq.s32.totalorder %v2776_v30, %v2709_v8  ;;  %v442_v43 = vsel %vm370_vm10, %v2716_v10, 0.0 }
 0x137   : > { %v440_v44 = vsel %vm368_vm11, %v2716_v10, 0.0  ;;  %vm374_vm12 = vcmp.eq.s32.totalorder %v2785_v33, %v2709_v8  ;;  %vm372_vm13 = vcmp.eq.s32.totalorder %v2788_v34, %v2709_v8  ;;  %v2797_v47 = vadd.s32 248, %v2599_v35 }
 0x138   : > { %v2800_v48 = vadd.s32 240, %v2599_v35  ;;  %v446_v51 = vsel %vm374_vm12, %v2716_v10, 0.0  ;;  %v444_v52 = vsel %vm372_vm13, %v2716_v10, 0.0 }
 0x139   : > { %3860 = vst [vmem:[#allocation31_spill] sm:$0xff] %v2797_v47  ;;  %vm378_vm14 = vcmp.eq.s32.totalorder %v2797_v47, %v2709_v8 }
 0x13a   : > { %473 = vadd.xlane.f32.xlu1 %v401_v55  ;;  %470 = vadd.xlane.f32.xlu0 %v399_v56  ;;  %3861 = vst [vmem:[#allocation32_spill] sm:$0xff] %v2800_v48  ;;  %vm376_vm15 = vcmp.eq.s32.totalorder %v2800_v48, %v2709_v8  ;;  %v450_v55 = vsel %vm378_vm14, %v2716_v10, 0.0 }
 0x13b   : > { %v448_v56 = vsel %vm376_vm15, %v2716_v10, 0.0 }
 0x13e   : > { %479 = vadd.xlane.f32.xlu1 %v405_v59  ;;  %476 = vadd.xlane.f32.xlu0 %v403_v60 }
 0x142   : > { %485 = vadd.xlane.f32.xlu1 %v409_v63  ;;  %482 = vadd.xlane.f32.xlu0 %v407_v1 }
 0x146   : > { %491 = vadd.xlane.f32.xlu1 %v413_v4  ;;  %488 = vadd.xlane.f32.xlu0 %v411_v5 }
 0x14a   : > { %497 = vadd.xlane.f32.xlu1 %v417_v11  ;;  %494 = vadd.xlane.f32.xlu0 %v415_v12 }
 0x14e   : > { %503 = vadd.xlane.f32.xlu1 %v422_v15  ;;  %500 = vadd.xlane.f32.xlu0 %v420_v16 }
 0x152   : > { %509 = vadd.xlane.f32.xlu1 %v426_v19  ;;  %506 = vadd.xlane.f32.xlu0 %v424_v20 }
 0x156   : > { %515 = vadd.xlane.f32.xlu1 %v430_v23  ;;  %512 = vadd.xlane.f32.xlu0 %v428_v24 }
 0x15a   : > { %521 = vadd.xlane.f32.xlu1 %v434_v27  ;;  %518 = vadd.xlane.f32.xlu0 %v432_v28 }
 0x15e   : > { %527 = vadd.xlane.f32.xlu1 %v438_v31  ;;  %524 = vadd.xlane.f32.xlu0 %v436_v32 }
 0x162   : > { %533 = vadd.xlane.f32.xlu1 %v442_v43  ;;  %530 = vadd.xlane.f32.xlu0 %v440_v44 }
 0x166   : > { %539 = vadd.xlane.f32.xlu1 %v446_v51  ;;  %536 = vadd.xlane.f32.xlu0 %v444_v52 }
 0x16a   : > { %545 = vadd.xlane.f32.xlu1 %v450_v55  ;;  %542 = vadd.xlane.f32.xlu0 %v448_v56 }
 0x1b7   : > { %v2810_v59 = vpop.xlane.xlu1 %458  ;;  %v2812_v60 = vpop.xlane.xlu0 %452 }
 0x1b8   : > { %vm547_vm0 = vcmp.le.f32.partialorder %v2623_v42, %v2812_v60  ;;  %vm548_vm1 = vcmp.le.f32.partialorder %v2716_v10, %v2812_v60  ;;  %vm551_vm2 = vcmp.le.f32.partialorder %v2623_v42, %v2810_v59  ;;  %vm552_vm3 = vcmp.le.f32.partialorder %v2716_v10, %v2810_v59 }
 0x1b9   : > { %v1893_v63 = vsel %vm547_vm0, 1.0, %v3806_v0  ;;  %v1894_v1 = vsel %vm548_vm1, 1.0, %v3806_v0  ;;  %v1897_v12 = vsel %vm551_vm2, 1.0, %v3806_v0  ;;  %v1898_v15 = vsel %vm552_vm3, 1.0, %v3806_v0 }
 0x1ba   : > { %v739_v4 = vadd.f32 %v1894_v1, %v1893_v63  ;;  %v745_v23 = vadd.f32 %v1898_v15, %v1897_v12 }
 0x1bb   : > { %v2824_v5 = vpop.xlane.xlu1 %461  ;;  %v2826_v11 = vpop.xlane.xlu0 %455 }
 0x1bc   : > { %740 = vadd.xlane.f32.xlu0 %v739_v4  ;;  %vm549_vm4 = vcmp.le.f32.partialorder %v2623_v42, %v2826_v11  ;;  %vm550_vm5 = vcmp.le.f32.partialorder %v2716_v10, %v2826_v11  ;;  %vm553_vm6 = vcmp.le.f32.partialorder %v2623_v42, %v2824_v5  ;;  %vm554_vm7 = vcmp.le.f32.partialorder %v2716_v10, %v2824_v5 }
 0x1bd   : > { %v1895_v16 = vsel %vm549_vm4, 1.0, %v3806_v0  ;;  %v1896_v19 = vsel %vm550_vm5, 1.0, %v3806_v0  ;;  %v1899_v28 = vsel %vm553_vm6, 1.0, %v3806_v0  ;;  %v1900_v31 = vsel %vm554_vm7, 1.0, %v3806_v0 }
 0x1be   : > { %v742_v20 = vadd.f32 %v1896_v19, %v1895_v16  ;;  %v748_v44 = vadd.f32 %v1900_v31, %v1899_v28 }
 0x1bf   : > { %v2840_v24 = vpop.xlane.xlu1 %467  ;;  %v2842_v27 = vpop.xlane.xlu0 %464 }
 0x1c0   : > { %743 = vadd.xlane.f32.xlu1 %v742_v20  ;;  %746 = vadd.xlane.f32.xlu0 %v745_v23  ;;  %vm555_vm8 = vcmp.le.f32.partialorder %v2623_v42, %v2842_v27  ;;  %vm556_vm9 = vcmp.le.f32.partialorder %v2716_v10, %v2842_v27  ;;  %vm557_vm10 = vcmp.le.f32.partialorder %v2623_v42, %v2840_v24 }
 0x1c1   : > { %v1901_v32 = vsel %vm555_vm8, 1.0, %v3806_v0  ;;  %v1902_v43 = vsel %vm556_vm9, 1.0, %v3806_v0  ;;  %vm558_vm11 = vcmp.le.f32.partialorder %v2716_v10, %v2840_v24  ;;  %v1903_v56 = vsel %vm557_vm10, 1.0, %v3806_v0 }
 0x1c2   : > { %v751_v51 = vadd.f32 %v1902_v43, %v1901_v32  ;;  %v1904_v63 = vsel %vm558_vm11, 1.0, %v3806_v0 }
 0x1c3   : > { %v2856_v52 = vpop.xlane.xlu1 %473  ;;  %v2858_v55 = vpop.xlane.xlu0 %470  ;;  %v754_v12 = vadd.f32 %v1904_v63, %v1903_v56 }
 0x1c4   : > { %749 = vadd.xlane.f32.xlu1 %v748_v44  ;;  %752 = vadd.xlane.f32.xlu0 %v751_v51  ;;  %vm559_vm12 = vcmp.le.f32.partialorder %v2623_v42, %v2858_v55  ;;  %vm560_vm13 = vcmp.le.f32.partialorder %v2716_v10, %v2858_v55  ;;  %vm561_vm14 = vcmp.le.f32.partialorder %v2623_v42, %v2856_v52 }
 0x1c5   : > { %v1905_v1 = vsel %vm559_vm12, 1.0, %v3806_v0  ;;  %v1906_v4 = vsel %vm560_vm13, 1.0, %v3806_v0  ;;  %vm562_vm15 = vcmp.le.f32.partialorder %v2716_v10, %v2856_v52  ;;  %v1907_v20 = vsel %vm561_vm14, 1.0, %v3806_v0 }
 0x1c6   : > { %v757_v15 = vadd.f32 %v1906_v4, %v1905_v1  ;;  %v1908_v23 = vsel %vm562_vm15, 1.0, %v3806_v0 }
 0x1c7   : > { %v2872_v16 = vpop.xlane.xlu1 %479  ;;  %v2874_v19 = vpop.xlane.xlu0 %476  ;;  %v760_v32 = vadd.f32 %v1908_v23, %v1907_v20 }
 0x1c8   : > { %755 = vadd.xlane.f32.xlu1 %v754_v12  ;;  %758 = vadd.xlane.f32.xlu0 %v757_v15  ;;  %vm563_vm0 = vcmp.le.f32.partialorder %v2623_v42, %v2874_v19  ;;  %vm564_vm1 = vcmp.le.f32.partialorder %v2716_v10, %v2874_v19  ;;  %vm565_vm2 = vcmp.le.f32.partialorder %v2623_v42, %v2872_v16 }
 0x1c9   : > { %v1909_v28 = vsel %vm563_vm0, 1.0, %v3806_v0  ;;  %v1910_v31 = vsel %vm564_vm1, 1.0, %v3806_v0  ;;  %vm566_vm3 = vcmp.le.f32.partialorder %v2716_v10, %v2872_v16  ;;  %v1911_v56 = vsel %vm565_vm2, 1.0, %v3806_v0 }
 0x1ca   : > { %v763_v43 = vadd.f32 %v1910_v31, %v1909_v28  ;;  %v1912_v63 = vsel %vm566_vm3, 1.0, %v3806_v0 }
 0x1cb   : > { %v2888_v44 = vpop.xlane.xlu1 %485  ;;  %v2890_v51 = vpop.xlane.xlu0 %482  ;;  %v766_v12 = vadd.f32 %v1912_v63, %v1911_v56 }
 0x1cc   : > { %761 = vadd.xlane.f32.xlu1 %v760_v32  ;;  %764 = vadd.xlane.f32.xlu0 %v763_v43  ;;  %vm567_vm4 = vcmp.le.f32.partialorder %v2623_v42, %v2890_v51  ;;  %vm568_vm5 = vcmp.le.f32.partialorder %v2716_v10, %v2890_v51  ;;  %vm569_vm6 = vcmp.le.f32.partialorder %v2623_v42, %v2888_v44 }
 0x1cd   : > { %v1913_v1 = vsel %vm567_vm4, 1.0, %v3806_v0  ;;  %v1914_v4 = vsel %vm568_vm5, 1.0, %v3806_v0  ;;  %vm570_vm7 = vcmp.le.f32.partialorder %v2716_v10, %v2888_v44  ;;  %v1915_v28 = vsel %vm569_vm6, 1.0, %v3806_v0 }
 0x1ce   : > { %v769_v15 = vadd.f32 %v1914_v4, %v1913_v1  ;;  %v1916_v31 = vsel %vm570_vm7, 1.0, %v3806_v0 }
 0x1cf   : > { %v2904_v20 = vpop.xlane.xlu1 %491  ;;  %v2906_v23 = vpop.xlane.xlu0 %488  ;;  %v772_v56 = vadd.f32 %v1916_v31, %v1915_v28 }
 0x1d0   : > { %3862 = vst [vmem:[#allocation33_spill] sm:$0xff] %v2904_v20  ;;  %767 = vadd.xlane.f32.xlu1 %v766_v12  ;;  %770 = vadd.xlane.f32.xlu0 %v769_v15  ;;  %vm571_vm8 = vcmp.le.f32.partialorder %v2623_v42, %v2906_v23  ;;  %vm572_vm9 = vcmp.le.f32.partialorder %v2716_v10, %v2906_v23 }
 0x1d1   : > { %vm573_vm10 = vcmp.le.f32.partialorder %v2623_v42, %v2904_v20  ;;  %v1917_v32 = vsel %vm571_vm8, 1.0, %v3806_v0  ;;  %v1918_v43 = vsel %vm572_vm9, 1.0, %v3806_v0  ;;  %vm574_vm11 = vcmp.le.f32.partialorder %v2716_v10, %v2904_v20 }
 0x1d2   : > { %v775_v63 = vadd.f32 %v1918_v43, %v1917_v32  ;;  %v1919_v12 = vsel %vm573_vm10, 1.0, %v3806_v0  ;;  %v1920_v15 = vsel %vm574_vm11, 1.0, %v3806_v0 }
 0x1d3   : > { %v2920_v1 = vpop.xlane.xlu1 %497  ;;  %v2922_v4 = vpop.xlane.xlu0 %494  ;;  %v778_v32 = vadd.f32 %v1920_v15, %v1919_v12 }
 0x1d4   : > { %3863 = vst [vmem:[#allocation34_spill] sm:$0xff] %v2920_v1  ;;  %3864 = vst [vmem:[#allocation35_spill] sm:$0xff] %v2922_v4  ;;  %773 = vadd.xlane.f32.xlu1 %v772_v56  ;;  %776 = vadd.xlane.f32.xlu0 %v775_v63  ;;  %vm575_vm12 = vcmp.le.f32.partialorder %v2623_v42, %v2922_v4  ;;  %vm576_vm13 = vcmp.le.f32.partialorder %v2716_v10, %v2922_v4 }
 0x1d5   : > { %vm577_vm14 = vcmp.le.f32.partialorder %v2623_v42, %v2920_v1  ;;  %v1921_v28 = vsel %vm575_vm12, 1.0, %v3806_v0  ;;  %v1922_v31 = vsel %vm576_vm13, 1.0, %v3806_v0  ;;  %vm578_vm15 = vcmp.le.f32.partialorder %v2716_v10, %v2920_v1 }
 0x1d6   : > { %v781_v43 = vadd.f32 %v1922_v31, %v1921_v28  ;;  %v1923_v38 = vsel %vm577_vm14, 1.0, %v3806_v0  ;;  %v1924_v6 = vsel %vm578_vm15, 1.0, %v3806_v0 }
 0x1d7   : > { %v2936_v56 = vpop.xlane.xlu1 %503  ;;  %v2938_v63 = vpop.xlane.xlu0 %500  ;;  %v784_v28 = vadd.f32 %v1924_v6, %v1923_v38 }
 0x1d8   : > { %3865 = vst [vmem:[#allocation36_spill] sm:$0xff] %v2936_v56  ;;  %3866 = vst [vmem:[#allocation37_spill] sm:$0xff] %v2938_v63  ;;  %779 = vadd.xlane.f32.xlu1 %v778_v32  ;;  %782 = vadd.xlane.f32.xlu0 %v781_v43  ;;  %vm579_vm0 = vcmp.le.f32.partialorder %v2623_v42, %v2938_v63  ;;  %vm580_vm1 = vcmp.le.f32.partialorder %v2716_v10, %v2938_v63 }
 0x1d9   : > { %vm581_vm2 = vcmp.le.f32.partialorder %v2623_v42, %v2936_v56  ;;  %v1925_v12 = vsel %vm579_vm0, 1.0, %v3806_v0  ;;  %v1926_v15 = vsel %vm580_vm1, 1.0, %v3806_v0  ;;  %vm582_vm3 = vcmp.le.f32.partialorder %v2716_v10, %v2936_v56 }
 0x1da   : > { %v787_v31 = vadd.f32 %v1926_v15, %v1925_v12  ;;  %v1927_v39 = vsel %vm581_vm2, 1.0, %v3806_v0  ;;  %v1928_v63 = vsel %vm582_vm3, 1.0, %v3806_v0  ;;  %v2970_v15 = vshra.s32 %v2709_v8, 4 }
 0x1db   : > { %v2952_v32 = vpop.xlane.xlu1 %509  ;;  %v2954_v43 = vpop.xlane.xlu0 %506 }
 0x1dc   : > { %3867 = vst [vmem:[#allocation38_spill] sm:$0xff] %v2954_v43  ;;  %785 = vadd.xlane.f32.xlu1 %v784_v28  ;;  %788 = vadd.xlane.f32.xlu0 %v787_v31  ;;  %vm583_vm4 = vcmp.le.f32.partialorder %v2623_v42, %v2954_v43  ;;  %vm584_vm5 = vcmp.le.f32.partialorder %v2716_v10, %v2954_v43  ;;  %v2974_v43 = vshra.s32 %v2604_v37, 4 }
 0x1dd   : > { %vm585_vm6 = vcmp.le.f32.partialorder %v2623_v42, %v2952_v32  ;;  %v1929_v38 = vsel %vm583_vm4, 1.0, %v3806_v0  ;;  %v1930_v6 = vsel %vm584_vm5, 1.0, %v3806_v0  ;;  %vm586_vm7 = vcmp.le.f32.partialorder %v2716_v10, %v2952_v32 }
 0x1de   : > { %v1931_v12 = vsel %vm585_vm6, 1.0, %v3806_v0  ;;  %v790_v28 = vadd.f32 %v1928_v63, %v1927_v39  ;;  %v793_v31 = vadd.f32 %v1930_v6, %v1929_v38  ;;  %v1932_v56 = vsel %vm586_vm7, 1.0, %v3806_v0 }
 0x1df   : > { %v2976_v1 = vpop.xlane.xlu1 %515  ;;  %v2978_v4 = vpop.xlane.xlu0 %512  ;;  %v796_v20 = vadd.f32 %v1932_v56, %v1931_v12  ;;  %v1183_v39 = vand.u32 15, %v2688_v2 }
 0x1e0   : > { %3868 = vst [vmem:[#allocation39_spill] sm:$0xff] %v2978_v4  ;;  %791 = vadd.xlane.f32.xlu1 %v790_v28  ;;  %794 = vadd.xlane.f32.xlu0 %v793_v31  ;;  %vm587_vm8 = vcmp.le.f32.partialorder %v2623_v42, %v2978_v4  ;;  %vm588_vm9 = vcmp.le.f32.partialorder %v2716_v10, %v2978_v4  ;;  %v3801_v31 = vmov 1.0  }
 0x1e1   : > { %vm589_vm10 = vcmp.le.f32.partialorder %v2623_v42, %v2976_v1  ;;  %v1933_v37 = vsel %vm587_vm8, 1.0, %v3806_v0  ;;  %v1934_v8 = vsel %vm588_vm9, 1.0, %v3806_v0  ;;  %vm590_vm11 = vcmp.le.f32.partialorder %v2716_v10, %v2976_v1 }
 0x1e2   : > { %v1935_v56 = vsel %vm589_vm10, 1.0, %v3806_v0  ;;  %v799_v63 = vadd.f32 %v1934_v8, %v1933_v37  ;;  %v1936_v38 = vsel %vm590_vm11, 1.0, %v3806_v0  ;;  %vm1231_vm12 = vcmp.eq.s32.totalorder %v1183_v39, %v2970_v15 }
 0x1e3   : > { %v2994_v6 = vpop.xlane.xlu1 %521  ;;  %v2996_v12 = vpop.xlane.xlu0 %518  ;;  %v802_v28 = vadd.f32 %v1936_v38, %v1935_v56  ;;  %2087 = vmatprep.subr.msk.mxu0 %vm1231_vm12, %v3801_v31  ;;  %2158 = vmatprep.subr.msk.mxu1 %vm1231_vm12, %v3801_v31  ;;  %v1182_v37 = vand.u32 15, %v2695_v3  ;;  %vm1230_vm1 = vcmp.eq.s32.totalorder %v1183_v39, %v2974_v43  ;;  %v1181_v39 = vand.u32 15, %v2680_v61 }
 0x1e4   : > { %3869 = vst [vmem:[#allocation40_spill] sm:$0xff] %v2994_v6  ;;  %3870 = vst [vmem:[#allocation41_spill] sm:$0xff] %v2996_v12  ;;  %797 = vadd.xlane.f32.xlu1 %v796_v20  ;;  %800 = vadd.xlane.f32.xlu0 %v799_v63  ;;  %vm591_vm13 = vcmp.le.f32.partialorder %v2623_v42, %v2996_v12  ;;  %vm592_vm14 = vcmp.le.f32.partialorder %v2716_v10, %v2996_v12  ;;  %v3873_v12 = vmov 1.0   ;;  %v1178_v61 = vand.u32 15, %v2671_v58 }
 0x1e5   : > { %vm593_vm15 = vcmp.le.f32.partialorder %v2623_v42, %v2994_v6  ;;  %v1937_v8 = vsel %vm591_vm13, 1.0, %v3806_v0  ;;  %v1938_v56 = vsel %vm592_vm14, 1.0, %v3806_v0  ;;  %vm594_vm0 = vcmp.le.f32.partialorder %v2716_v10, %v2994_v6  ;;  %2088 = vmatpush1.msk.msra.mxu0 %vm1230_vm1, %v3873_v12  ;;  %2190 = vmatpush1.msk.msra.mxu1 %vm1230_vm1, %v3873_v12 }
 0x1e6   : > { %v1939_v20 = vsel %vm593_vm15, 1.0, %v3806_v0  ;;  %v805_v63 = vadd.f32 %v1938_v56, %v1937_v8  ;;  %v1940_v38 = vsel %vm594_vm0, 1.0, %v3806_v0  ;;  %vm3015_vm2 = vcmp.eq.s32.totalorder %v1182_v37, %v2970_v15 }
 0x1e7   : > { %v3019_v2 = vpop.xlane.xlu1 %527  ;;  %v3021_v3 = vpop.xlane.xlu0 %524  ;;  %vm3026_vm3 = vcmp.eq.s32.totalorder %v1182_v37, %v2974_v43  ;;  %v1180_v56 = vand.u32 15, %v2683_v62  ;;  %v808_v0 = vadd.f32 %v1940_v38, %v1939_v20  ;;  %v3876_v37 = vmov 0.0   ;;  %2089 = vmatprep.subr.msk.mxu0 %vm3015_vm2, %v3873_v12  ;;  %2159 = vmatprep.subr.msk.mxu1 %vm3015_vm2, %v3873_v12 }
 0x1e8   : > { %803 = vadd.xlane.f32.xlu1 %v802_v28  ;;  %806 = vadd.xlane.f32.xlu0 %v805_v63  ;;  %vm595_vm4 = vcmp.le.f32.partialorder %v2623_v42, %v3021_v3  ;;  %vm596_vm5 = vcmp.le.f32.partialorder %v2716_v10, %v3021_v3  ;;  %vm597_vm6 = vcmp.le.f32.partialorder %v2623_v42, %v3019_v2  ;;  %v1177_v38 = vand.u32 15, %v2656_v53 }
 0x1e9   : > { %v1941_v6 = vsel %vm595_vm4, 1.0, %v3876_v37  ;;  %v1942_v4 = vsel %vm596_vm5, 1.0, %v3876_v37  ;;  %vm598_vm7 = vcmp.le.f32.partialorder %v2716_v10, %v3019_v2  ;;  %v1943_v63 = vsel %vm597_vm6, 1.0, %v3876_v37  ;;  %2090 = vmatpush1.msk.msra.mxu0 %vm3026_vm3, %v3873_v12  ;;  %2191 = vmatpush1.msk.msra.mxu1 %vm3026_vm3, %v3873_v12 }
 0x1ea   : > { %v811_v28 = vadd.f32 %v1942_v4, %v1941_v6  ;;  %vm1227_vm8 = vcmp.eq.s32.totalorder %v1181_v39, %v2970_v15  ;;  %vm3057_vm9 = vcmp.eq.s32.totalorder %v1181_v39, %v2974_v43  ;;  %v1944_v6 = vsel %vm598_vm7, 1.0, %v3876_v37 }
 0x1eb   : > { %v3061_v31 = vpop.xlane.xlu1 %533  ;;  %v3063_v4 = vpop.xlane.xlu0 %530  ;;  %2091 = vmatprep.subr.msk.mxu0 %vm1227_vm8, %v3873_v12  ;;  %2160 = vmatprep.subr.msk.mxu1 %vm1227_vm8, %v3873_v12  ;;  %vm3069_vm10 = vcmp.eq.s32.totalorder %v1180_v56, %v2970_v15  ;;  %vm3074_vm11 = vcmp.eq.s32.totalorder %v1180_v56, %v2974_v43  ;;  %v1179_v39 = vand.u32 15, %v2668_v57  ;;  %vm3125_vm2 = vcmp.eq.s32.totalorder %v1178_v61, %v2970_v15 }
 0x1ec   : > { %3879 = vst [vmem:[#allocation42_spill] sm:$0xff] %v3061_v31  ;;  %809 = vadd.xlane.f32.xlu1 %v808_v0  ;;  %812 = vadd.xlane.f32.xlu0 %v811_v28  ;;  %vm599_vm12 = vcmp.le.f32.partialorder %v2623_v42, %v3063_v4  ;;  %vm600_vm13 = vcmp.le.f32.partialorder %v2716_v10, %v3063_v4  ;;  %v1176_v53 = vand.u32 15, %v2659_v54 }
 0x1ed   : > { %vm601_vm14 = vcmp.le.f32.partialorder %v2623_v42, %v3061_v31  ;;  %v1945_v56 = vsel %vm599_vm12, 1.0, %v3876_v37  ;;  %v1946_v62 = vsel %vm600_vm13, 1.0, %v3876_v37  ;;  %vm602_vm15 = vcmp.le.f32.partialorder %v2716_v10, %v3061_v31  ;;  %2092 = vmatpush1.msk.msra.mxu0 %vm3057_vm9, %v3873_v12  ;;  %2192 = vmatpush1.msk.msra.mxu1 %vm3057_vm9, %v3873_v12 }
 0x1ee   : > { %v814_v0 = vadd.f32 %v1944_v6, %v1943_v63  ;;  %v817_v28 = vadd.f32 %v1946_v62, %v1945_v56  ;;  %v1947_v57 = vsel %vm601_vm14, 1.0, %v3876_v37  ;;  %2093 = vmatprep.subr.msk.mxu0 %vm3069_vm10, %v3873_v12  ;;  %2161 = vmatprep.subr.msk.mxu1 %vm3069_vm10, %v3873_v12  ;;  %vm3104_vm0 = vcmp.eq.s32.totalorder %v1179_v39, %v2970_v15 }
 0x1ef   : > { %v3108_v31 = vpop.xlane.xlu1 %539  ;;  %v3110_v20 = vpop.xlane.xlu0 %536  ;;  %v1948_v62 = vsel %vm602_vm15, 1.0, %v3876_v37  ;;  %2094 = vmatpush1.msk.msra.mxu0 %vm3074_vm11, %v3873_v12  ;;  %2193 = vmatpush1.msk.msra.mxu1 %vm3074_vm11, %v3873_v12  ;;  %vm3120_vm1 = vcmp.eq.s32.totalorder %v1179_v39, %v2974_v43  ;;  %vm3153_vm7 = vcmp.eq.s32.totalorder %v1178_v61, %v2974_v43  ;;  %vm3171_vm8 = vcmp.eq.s32.totalorder %v1177_v38, %v2970_v15 }
 0x1f0   : > { %3886 = vst [vmem:[#allocation43_spill] sm:$0xff] %v3110_v20  ;;  %815 = vadd.xlane.f32.xlu1 %v814_v0  ;;  %818 = vadd.xlane.f32.xlu0 %v817_v28  ;;  %vm603_vm3 = vcmp.le.f32.partialorder %v2623_v42, %v3110_v20  ;;  %vm604_vm4 = vcmp.le.f32.partialorder %v2716_v10, %v3110_v20  ;;  %v1175_v6 = vand.u32 15, %v2644_v49  ;;  %v1173_v28 = vand.u32 15, %v2632_v45 }
 0x1f1   : > { %vm605_vm5 = vcmp.le.f32.partialorder %v2623_v42, %v3108_v31  ;;  %v1949_v8 = vsel %vm603_vm3, 1.0, %v3876_v37  ;;  %v1950_v39 = vsel %vm604_vm4, 1.0, %v3876_v37  ;;  %vm606_vm6 = vcmp.le.f32.partialorder %v2716_v10, %v3108_v31  ;;  %2095 = vmatprep.subr.msk.mxu0 %vm3104_vm0, %v3873_v12  ;;  %2162 = vmatprep.subr.msk.mxu1 %vm3104_vm0, %v3873_v12 }
 0x1f2   : > { %v820_v56 = vadd.f32 %v1948_v62, %v1947_v57  ;;  %v823_v0 = vadd.f32 %v1950_v39, %v1949_v8  ;;  %2096 = vmatpush1.msk.msra.mxu0 %vm3120_vm1, %v3873_v12  ;;  %2194 = vmatpush1.msk.msra.mxu1 %vm3120_vm1, %v3873_v12  ;;  %v1951_v57 = vsel %vm605_vm5, 1.0, %v3876_v37  ;;  %v1952_v62 = vsel %vm606_vm6, 1.0, %v3876_v37 }
 0x1f3   : > { %v3158_v20 = vpop.xlane.xlu1 %545  ;;  %v3160_v58 = vpop.xlane.xlu0 %542  ;;  %2097 = vmatprep.subr.msk.mxu0 %vm3125_vm2, %v3873_v12  ;;  %2163 = vmatprep.subr.msk.mxu1 %vm3125_vm2, %v3873_v12  ;;  %vm3176_vm9 = vcmp.eq.s32.totalorder %v1177_v38, %v2974_v43  ;;  %v826_v39 = vadd.f32 %v1952_v62, %v1951_v57  ;;  %vm1217_vm14 = vcmp.eq.s32.totalorder %v1176_v53, %v2970_v15  ;;  %v1171_v62 = vand.u32 15, %v2616_v40 }
 0x1f4   : > { %821 = vadd.xlane.f32.xlu1 %v820_v56  ;;  %824 = vadd.xlane.f32.xlu0 %v823_v0  ;;  %vm607_vm10 = vcmp.le.f32.partialorder %v2623_v42, %v3160_v58  ;;  %vm608_vm11 = vcmp.le.f32.partialorder %v2716_v10, %v3160_v58  ;;  %vm609_vm12 = vcmp.le.f32.partialorder %v2623_v42, %v3158_v20  ;;  %v1174_v42 = vand.u32 15, %v2647_v50 }
 0x1f5   : > { %v1953_v8 = vsel %vm607_vm10, 1.0, %v3876_v37  ;;  %v1954_v38 = vsel %vm608_vm11, 1.0, %v3876_v37  ;;  %vm610_vm13 = vcmp.le.f32.partialorder %v2716_v10, %v3158_v20  ;;  %2098 = vmatpush1.msk.msra.mxu0 %vm3153_vm7, %v3873_v12  ;;  %2195 = vmatpush1.msk.msra.mxu1 %vm3153_vm7, %v3873_v12  ;;  %v1955_v10 = vsel %vm609_vm12, 1.0, %v3876_v37 }
 0x1f6   : > { %v829_v56 = vadd.f32 %v1954_v38, %v1953_v8  ;;  %2099 = vmatprep.subr.msk.mxu0 %vm3171_vm8, %v3873_v12  ;;  %2164 = vmatprep.subr.msk.mxu1 %vm3171_vm8, %v3873_v12  ;;  %v1956_v0 = vsel %vm610_vm13, 1.0, %v3876_v37  ;;  %vm1216_vm15 = vcmp.eq.s32.totalorder %v1176_v53, %v2974_v43  ;;  %vm1215_vm0 = vcmp.eq.s32.totalorder %v1175_v6, %v2970_v15 }
 0x1f7   : > { %2100 = vmatpush1.msk.msra.mxu0 %vm3176_vm9, %v3873_v12  ;;  %2196 = vmatpush1.msk.msra.mxu1 %vm3176_vm9, %v3873_v12  ;;  %vm1214_vm1 = vcmp.eq.s32.totalorder %v1175_v6, %v2974_v43  ;;  %v832_v57 = vadd.f32 %v1956_v0, %v1955_v10  ;;  %vm1213_vm2 = vcmp.eq.s32.totalorder %v1174_v42, %v2970_v15  ;;  %v1172_v53 = vand.u32 15, %v2635_v46 }
 0x1f8   : > { %827 = vadd.xlane.f32.xlu1 %v826_v39  ;;  %830 = vadd.xlane.f32.xlu0 %v829_v56  ;;  %vm1212_vm3 = vcmp.eq.s32.totalorder %v1174_v42, %v2974_v43  ;;  %vm1211_vm4 = vcmp.eq.s32.totalorder %v1173_v28, %v2970_v15  ;;  %vm1210_vm5 = vcmp.eq.s32.totalorder %v1173_v28, %v2974_v43  ;;  %v1170_v61 = vand.u32 15, %v2602_v36 }
 0x1f9   : > { %2101 = vmatprep.subr.msk.mxu0 %vm1217_vm14, %v3873_v12  ;;  %2165 = vmatprep.subr.msk.mxu1 %vm1217_vm14, %v3873_v12  ;;  %vm1209_vm6 = vcmp.eq.s32.totalorder %v1172_v53, %v2970_v15  ;;  %vm1208_vm7 = vcmp.eq.s32.totalorder %v1172_v53, %v2974_v43  ;;  %vm1207_vm8 = vcmp.eq.s32.totalorder %v1171_v62, %v2970_v15  ;;  %v1169_v63 = vand.u32 15, %v2619_v41 }
 0x1fa   : > { %2102 = vmatpush1.msk.msra.mxu0 %vm1216_vm15, %v3873_v12  ;;  %2197 = vmatpush1.msk.msra.mxu1 %vm1216_vm15, %v3873_v12  ;;  %vm1206_vm9 = vcmp.eq.s32.totalorder %v1171_v62, %v2974_v43  ;;  %vm1205_vm10 = vcmp.eq.s32.totalorder %v1170_v61, %v2970_v15  ;;  %v1168_v6 = vand.u32 15, %v2599_v35  ;;  %vm1204_vm11 = vcmp.eq.s32.totalorder %v1170_v61, %v2974_v43 }
 0x1fb   : > { %2103 = vmatprep.subr.msk.mxu0 %vm1215_vm0, %v3873_v12  ;;  %2166 = vmatprep.subr.msk.mxu1 %vm1215_vm0, %v3873_v12  ;;  %vm1203_vm12 = vcmp.eq.s32.totalorder %v1169_v63, %v2970_v15  ;;  %v1199_v8 = vand.u32 15, %v2797_v47  ;;  %vm1202_vm13 = vcmp.eq.s32.totalorder %v1169_v63, %v2974_v43  ;;  %v1198_v38 = vand.u32 15, %v2800_v48 }
 0x1fc   : > { %833 = vadd.xlane.f32.xlu1 %v832_v57  ;;  %2104 = vmatpush1.msk.msra.mxu0 %vm1214_vm1, %v3873_v12  ;;  %vm1201_vm14 = vcmp.eq.s32.totalorder %v1168_v6, %v2970_v15  ;;  %vm1200_vm15 = vcmp.eq.s32.totalorder %v1168_v6, %v2974_v43  ;;  %v1197_v39 = vand.u32 15, %v2785_v33  ;;  %v1196_v56 = vand.u32 15, %v2788_v34 }
 0x1fd   : > { %2198 = vmatpush1.msk.msra.mxu1 %vm1214_vm1, %v3873_v12  ;;  %2105 = vmatprep.subr.msk.mxu0 %vm1213_vm2, %v3873_v12  ;;  %vm1263_vm0 = vcmp.eq.s32.totalorder %v1199_v8, %v2970_v15  ;;  %vm1262_vm1 = vcmp.eq.s32.totalorder %v1199_v8, %v2974_v43  ;;  %v1195_v42 = vand.u32 15, %v2773_v29  ;;  %v1194_v10 = vand.u32 15, %v2776_v30 }
 0x1fe   : > { %2167 = vmatprep.subr.msk.mxu1 %vm1213_vm2, %v3873_v12  ;;  %2106 = vmatpush1.msk.msra.mxu0 %vm1212_vm3, %v3873_v12  ;;  %vm1261_vm2 = vcmp.eq.s32.totalorder %v1198_v38, %v2970_v15  ;;  %v1193_v0 = vand.u32 15, %v2761_v25  ;;  %v1192_v28 = vand.u32 15, %v2764_v26  ;;  %v1191_v57 = vand.u32 15, %v2749_v21 }
 0x1ff   : > { %2199 = vmatpush1.msk.msra.mxu1 %vm1212_vm3, %v3873_v12  ;;  %2107 = vmatprep.subr.msk.mxu0 %vm1211_vm4, %v3873_v12  ;;  %vm1260_vm3 = vcmp.eq.s32.totalorder %v1198_v38, %v2974_v43  ;;  %v1190_v53 = vand.u32 15, %v2752_v22  ;;  %v1189_v62 = vand.u32 15, %v2737_v17  ;;  %v1188_v61 = vand.u32 15, %v2740_v18 }
 0x200   : > { %2168 = vmatprep.subr.msk.mxu1 %vm1211_vm4, %v3873_v12  ;;  %2108 = vmatpush1.msk.msra.mxu0 %vm1210_vm5, %v3873_v12  ;;  %vm1259_vm4 = vcmp.eq.s32.totalorder %v1197_v39, %v2970_v15  ;;  %v1187_v63 = vand.u32 15, %v2725_v13  ;;  %v1186_v6 = vand.u32 15, %v2728_v14  ;;  %v1185_v8 = vand.u32 15, %v2706_v7 }
 0x201   : > { %2200 = vmatpush1.msk.msra.mxu1 %vm1210_vm5, %v3873_v12  ;;  %2109 = vmatprep.subr.msk.mxu0 %vm1209_vm6, %v3873_v12  ;;  %vm1258_vm5 = vcmp.eq.s32.totalorder %v1197_v39, %v2974_v43  ;;  %v1184_v38 = vand.u32 15, %v2712_v9 }
 0x202   : > { %2169 = vmatprep.subr.msk.mxu1 %vm1209_vm6, %v3873_v12  ;;  %2110 = vmatpush1.msk.msra.mxu0 %vm1208_vm7, %v3873_v12  ;;  %vm1257_vm6 = vcmp.eq.s32.totalorder %v1196_v56, %v2970_v15 }
 0x203   : > { %2201 = vmatpush1.msk.msra.mxu1 %vm1208_vm7, %v3873_v12  ;;  %2111 = vmatprep.subr.msk.mxu0 %vm1207_vm8, %v3873_v12  ;;  %vm1256_vm7 = vcmp.eq.s32.totalorder %v1196_v56, %v2974_v43 }
 0x204   : > { %2170 = vmatprep.subr.msk.mxu1 %vm1207_vm8, %v3873_v12  ;;  %2112 = vmatpush1.msk.msra.mxu0 %vm1206_vm9, %v3873_v12  ;;  %vm1255_vm8 = vcmp.eq.s32.totalorder %v1195_v42, %v2970_v15 }
 0x205   : > { %2202 = vmatpush1.msk.msra.mxu1 %vm1206_vm9, %v3873_v12  ;;  %2113 = vmatprep.subr.msk.mxu0 %vm1205_vm10, %v3873_v12  ;;  %vm1254_vm9 = vcmp.eq.s32.totalorder %v1195_v42, %v2974_v43 }
 0x206   : > { %2171 = vmatprep.subr.msk.mxu1 %vm1205_vm10, %v3873_v12  ;;  %2114 = vmatpush1.msk.msra.mxu0 %vm1204_vm11, %v3873_v12  ;;  %vm1253_vm10 = vcmp.eq.s32.totalorder %v1194_v10, %v2970_v15 }
 0x207   : > { %2203 = vmatpush1.msk.msra.mxu1 %vm1204_vm11, %v3873_v12  ;;  %2115 = vmatprep.subr.msk.mxu0 %vm1203_vm12, %v3873_v12  ;;  %vm1252_vm11 = vcmp.eq.s32.totalorder %v1194_v10, %v2974_v43 }
 0x208   : > { %2172 = vmatprep.subr.msk.mxu1 %vm1203_vm12, %v3873_v12  ;;  %2116 = vmatpush1.msk.msra.mxu0 %vm1202_vm13, %v3873_v12  ;;  %vm1251_vm12 = vcmp.eq.s32.totalorder %v1193_v0, %v2970_v15 }
 0x209   : > { %2204 = vmatpush1.msk.msra.mxu1 %vm1202_vm13, %v3873_v12  ;;  %2117 = vmatprep.subr.msk.mxu0 %vm1201_vm14, %v3873_v12  ;;  %vm1250_vm13 = vcmp.eq.s32.totalorder %v1193_v0, %v2974_v43 }
 0x20a   : > { %2173 = vmatprep.subr.msk.mxu1 %vm1201_vm14, %v3873_v12  ;;  %2118 = vmatpush1.msk.msra.mxu0 %vm1200_vm15, %v3873_v12  ;;  %vm1249_vm14 = vcmp.eq.s32.totalorder %v1192_v28, %v2970_v15 }
 0x20b   : > { %2205 = vmatpush1.msk.msra.mxu1 %vm1200_vm15, %v3873_v12  ;;  %2119 = vmatprep.subr.msk.mxu0 %vm1263_vm0, %v3873_v12  ;;  %vm1248_vm15 = vcmp.eq.s32.totalorder %v1192_v28, %v2974_v43 }
 0x20c   : > { %2174 = vmatprep.subr.msk.mxu1 %vm1263_vm0, %v3873_v12  ;;  %2120 = vmatpush2.msk.msra.mxu0 %vm1262_vm1, %v3873_v12  ;;  %vm1247_vm0 = vcmp.eq.s32.totalorder %v1191_v57, %v2970_v15 }
 0x20d   : > { %2206 = vmatpush2.msk.msra.mxu1 %vm1262_vm1, %v3873_v12  ;;  %2121 = vmatprep.subr.msk.mxu0 %vm1261_vm2, %v3873_v12  ;;  %vm1246_vm1 = vcmp.eq.s32.totalorder %v1191_v57, %v2974_v43 }
 0x20e   : > { %2175 = vmatprep.subr.msk.mxu1 %vm1261_vm2, %v3873_v12  ;;  %2122 = vmatpush2.msk.msra.mxu0 %vm1260_vm3, %v3873_v12  ;;  %vm1245_vm2 = vcmp.eq.s32.totalorder %v1190_v53, %v2970_v15 }
 0x20f   : > { %2207 = vmatpush2.msk.msra.mxu1 %vm1260_vm3, %v3873_v12  ;;  %2123 = vmatprep.subr.msk.mxu0 %vm1259_vm4, %v3873_v12  ;;  %vm1244_vm3 = vcmp.eq.s32.totalorder %v1190_v53, %v2974_v43 }
 0x210   : > { %2176 = vmatprep.subr.msk.mxu1 %vm1259_vm4, %v3873_v12  ;;  %2124 = vmatpush2.msk.msra.mxu0 %vm1258_vm5, %v3873_v12  ;;  %vm1243_vm4 = vcmp.eq.s32.totalorder %v1189_v62, %v2970_v15 }
 0x211   : > { %2208 = vmatpush2.msk.msra.mxu1 %vm1258_vm5, %v3873_v12  ;;  %2125 = vmatprep.subr.msk.mxu0 %vm1257_vm6, %v3873_v12  ;;  %vm1242_vm5 = vcmp.eq.s32.totalorder %v1189_v62, %v2974_v43 }
 0x212   : > { %2177 = vmatprep.subr.msk.mxu1 %vm1257_vm6, %v3873_v12  ;;  %2126 = vmatpush2.msk.msra.mxu0 %vm1256_vm7, %v3873_v12  ;;  %vm1241_vm6 = vcmp.eq.s32.totalorder %v1188_v61, %v2970_v15 }
 0x213   : > { %2209 = vmatpush2.msk.msra.mxu1 %vm1256_vm7, %v3873_v12  ;;  %2127 = vmatprep.subr.msk.mxu0 %vm1255_vm8, %v3873_v12  ;;  %vm1240_vm7 = vcmp.eq.s32.totalorder %v1188_v61, %v2974_v43 }
 0x214   : > { %2178 = vmatprep.subr.msk.mxu1 %vm1255_vm8, %v3873_v12  ;;  %2128 = vmatpush2.msk.msra.mxu0 %vm1254_vm9, %v3873_v12  ;;  %vm1239_vm8 = vcmp.eq.s32.totalorder %v1187_v63, %v2970_v15 }
 0x215   : > { %2210 = vmatpush2.msk.msra.mxu1 %vm1254_vm9, %v3873_v12  ;;  %2129 = vmatprep.subr.msk.mxu0 %vm1253_vm10, %v3873_v12  ;;  %vm1238_vm9 = vcmp.eq.s32.totalorder %v1187_v63, %v2974_v43 }
 0x216   : > { %2179 = vmatprep.subr.msk.mxu1 %vm1253_vm10, %v3873_v12  ;;  %2130 = vmatpush2.msk.msra.mxu0 %vm1252_vm11, %v3873_v12  ;;  %vm1237_vm10 = vcmp.eq.s32.totalorder %v1186_v6, %v2970_v15 }
 0x217   : > { %2211 = vmatpush2.msk.msra.mxu1 %vm1252_vm11, %v3873_v12  ;;  %2131 = vmatprep.subr.msk.mxu0 %vm1251_vm12, %v3873_v12  ;;  %vm1236_vm11 = vcmp.eq.s32.totalorder %v1186_v6, %v2974_v43 }
 0x218   : > { %2180 = vmatprep.subr.msk.mxu1 %vm1251_vm12, %v3873_v12  ;;  %2132 = vmatpush2.msk.msra.mxu0 %vm1250_vm13, %v3873_v12  ;;  %vm1235_vm12 = vcmp.eq.s32.totalorder %v1185_v8, %v2970_v15 }
 0x219   : > { %2212 = vmatpush2.msk.msra.mxu1 %vm1250_vm13, %v3873_v12  ;;  %2133 = vmatprep.subr.msk.mxu0 %vm1249_vm14, %v3873_v12  ;;  %vm1234_vm13 = vcmp.eq.s32.totalorder %v1185_v8, %v2974_v43 }
 0x21a   : > { %2181 = vmatprep.subr.msk.mxu1 %vm1249_vm14, %v3873_v12  ;;  %2134 = vmatpush2.msk.msra.mxu0 %vm1248_vm15, %v3873_v12  ;;  %vm1233_vm14 = vcmp.eq.s32.totalorder %v1184_v38, %v2970_v15 }
 0x21b   : > { %2213 = vmatpush2.msk.msra.mxu1 %vm1248_vm15, %v3873_v12  ;;  %2135 = vmatprep.subr.msk.mxu0 %vm1247_vm0, %v3873_v12  ;;  %vm1232_vm15 = vcmp.eq.s32.totalorder %v1184_v38, %v2974_v43 }
 0x21c   : > { %2182 = vmatprep.subr.msk.mxu1 %vm1247_vm0, %v3873_v12  ;;  %2136 = vmatpush2.msk.msra.mxu0 %vm1246_vm1, %v3873_v12 }
 0x21d   : > { %2214 = vmatpush2.msk.msra.mxu1 %vm1246_vm1, %v3873_v12  ;;  %2137 = vmatprep.subr.msk.mxu0 %vm1245_vm2, %v3873_v12 }
 0x21e   : > { %2183 = vmatprep.subr.msk.mxu1 %vm1245_vm2, %v3873_v12  ;;  %2138 = vmatpush2.msk.msra.mxu0 %vm1244_vm3, %v3873_v12 }
 0x21f   : > { %2215 = vmatpush2.msk.msra.mxu1 %vm1244_vm3, %v3873_v12  ;;  %2139 = vmatprep.subr.msk.mxu0 %vm1243_vm4, %v3873_v12 }
 0x220   : > { %2184 = vmatprep.subr.msk.mxu1 %vm1243_vm4, %v3873_v12  ;;  %2140 = vmatpush2.msk.msra.mxu0 %vm1242_vm5, %v3873_v12 }
 0x221   : > { %2216 = vmatpush2.msk.msra.mxu1 %vm1242_vm5, %v3873_v12  ;;  %2141 = vmatprep.subr.msk.mxu0 %vm1241_vm6, %v3873_v12 }
 0x222   : > { %2185 = vmatprep.subr.msk.mxu1 %vm1241_vm6, %v3873_v12  ;;  %2142 = vmatpush2.msk.msra.mxu0 %vm1240_vm7, %v3873_v12 }
 0x223   : > { %2217 = vmatpush2.msk.msra.mxu1 %vm1240_vm7, %v3873_v12  ;;  %2143 = vmatprep.subr.msk.mxu0 %vm1239_vm8, %v3873_v12 }
 0x224   : > { %2186 = vmatprep.subr.msk.mxu1 %vm1239_vm8, %v3873_v12  ;;  %2144 = vmatpush2.msk.msra.mxu0 %vm1238_vm9, %v3873_v12 }
 0x225   : > { %2218 = vmatpush2.msk.msra.mxu1 %vm1238_vm9, %v3873_v12  ;;  %2145 = vmatprep.subr.msk.mxu0 %vm1237_vm10, %v3873_v12 }
 0x226   : > { %2187 = vmatprep.subr.msk.mxu1 %vm1237_vm10, %v3873_v12  ;;  %2146 = vmatpush2.msk.msra.mxu0 %vm1236_vm11, %v3873_v12 }
 0x227   : > { %2219 = vmatpush2.msk.msra.mxu1 %vm1236_vm11, %v3873_v12  ;;  %2147 = vmatprep.subr.msk.mxu0 %vm1235_vm12, %v3873_v12 }
 0x228   : > { %2188 = vmatprep.subr.msk.mxu1 %vm1235_vm12, %v3873_v12  ;;  %2148 = vmatpush2.msk.msra.mxu0 %vm1234_vm13, %v3873_v12 }
 0x229   : > { %2220 = vmatpush2.msk.msra.mxu1 %vm1234_vm13, %v3873_v12  ;;  %2149 = vmatprep.subr.msk.mxu0 %vm1233_vm14, %v3873_v12 }
 0x22a   : > { %2189 = vmatprep.subr.msk.mxu1 %vm1233_vm14, %v3873_v12  ;;  %2150 = vmatpush2.msk.msra.mxu0 %vm1232_vm15, %v3873_v12 }
 0x22b   : > { %2221 = vmatpush2.msk.msra.mxu1 %vm1232_vm15, %v3873_v12 }
 0x245   : > { %v741_v39 = vpop.xlane.xlu0 %740 }
 0x246   : > { %vm835_vm0 = vcmp.ge.f32.partialorder %v741_v39, 128.0 }
 0x247   : > { %v867_v21 = vsel %vm835_vm0, %v2812_v60, inf }
 0x249   : > { %v744_v56 = vpop.xlane.xlu1 %743  ;;  %v747_v42 = vpop.xlane.xlu0 %746 }
 0x24a   : > { %vm836_vm1 = vcmp.ge.f32.partialorder %v744_v56, 128.0  ;;  %vm837_vm5 = vcmp.ge.f32.partialorder %v747_v42, 128.0 }
 0x24b   : > { %v868_v22 = vsel %vm836_vm1, %v2826_v11, inf  ;;  %v869_v56 = vsel %vm837_vm5, %v2810_v59, inf }
 0x24d   : > { %v750_v10 = vpop.xlane.xlu1 %749  ;;  %v753_v0 = vpop.xlane.xlu0 %752 }
 0x24e   : > { %vm839_vm2 = vcmp.ge.f32.partialorder %v753_v0, 128.0  ;;  %vm838_vm6 = vcmp.ge.f32.partialorder %v750_v10, 128.0 }
 0x24f   : > { %v871_v17 = vsel %vm839_vm2, %v2842_v27, inf  ;;  %v870_v42 = vsel %vm838_vm6, %v2824_v5, inf }
 0x251   : > { %v756_v28 = vpop.xlane.xlu1 %755  ;;  %v759_v57 = vpop.xlane.xlu0 %758 }
 0x252   : > { %vm840_vm3 = vcmp.ge.f32.partialorder %v756_v28, 128.0  ;;  %vm841_vm4 = vcmp.ge.f32.partialorder %v759_v57, 128.0  ;;  %v899_v28 = vmin.f32 %v867_v21, %v871_v17 }
 0x253   : > { %v872_v18 = vsel %vm840_vm3, %v2840_v24, inf  ;;  %v873_v39 = vsel %vm841_vm4, %v2858_v55, inf }
 0x254   : > { %v900_v27 = vmin.f32 %v868_v22, %v872_v18  ;;  %v901_v57 = vmin.f32 %v869_v56, %v873_v39  ;;  %v3898_v22 = vld [vmem:[#allocation35_spill] sm:$0xff] }
 0x255   : > { %v762_v53 = vpop.xlane.xlu1 %761  ;;  %v765_v62 = vpop.xlane.xlu0 %764 }
 0x256   : > { %vm842_vm7 = vcmp.ge.f32.partialorder %v762_v53, 128.0  ;;  %vm843_vm8 = vcmp.ge.f32.partialorder %v765_v62, 128.0  ;;  %v3897_v53 = vld [vmem:[#allocation33_spill] sm:$0xff] }
 0x257   : > { %v874_v10 = vsel %vm842_vm7, %v2856_v52, inf  ;;  %v875_v0 = vsel %vm843_vm8, %v2874_v19, inf }
 0x258   : > { %v902_v24 = vmin.f32 %v870_v42, %v874_v10  ;;  %v903_v59 = vmin.f32 %v899_v28, %v875_v0 }
 0x259   : > { %v768_v61 = vpop.xlane.xlu1 %767  ;;  %v771_v63 = vpop.xlane.xlu0 %770 }
 0x25a   : > { %vm844_vm9 = vcmp.ge.f32.partialorder %v768_v61, 128.0  ;;  %vm845_vm10 = vcmp.ge.f32.partialorder %v771_v63, 128.0 }
 0x25b   : > { %v876_v55 = vsel %vm844_vm9, %v2872_v16, inf  ;;  %v877_v5 = vsel %vm845_vm10, %v2890_v51, inf  ;;  %v3899_v16 = vld [vmem:[#allocation34_spill] sm:$0xff] }
 0x25c   : > { %v904_v21 = vmin.f32 %v900_v27, %v876_v55  ;;  %v3904_v55 = vld [vmem:[#allocation41_spill] sm:$0xff] }
 0x25d   : > { %v774_v6 = vpop.xlane.xlu1 %773  ;;  %v777_v8 = vpop.xlane.xlu0 %776 }
 0x25e   : > { %vm846_vm11 = vcmp.ge.f32.partialorder %v774_v6, 128.0  ;;  %vm847_vm12 = vcmp.ge.f32.partialorder %v777_v8, 128.0  ;;  %v3900_v6 = vld [vmem:[#allocation37_spill] sm:$0xff]  ;;  %v3901_v8 = vld [vmem:[#allocation36_spill] sm:$0xff] }
 0x25f   : > { %v878_v52 = vsel %vm846_vm11, %v2888_v44, inf  ;;  %v879_v19 = vsel %vm847_vm12, %v2906_v23, inf }
 0x260   : > { %v906_v63 = vmin.f32 %v902_v24, %v878_v52  ;;  %v907_v51 = vmin.f32 %v903_v59, %v879_v19  ;;  %v3905_v59 = vld [vmem:[#allocation40_spill] sm:$0xff] }
 0x261   : > { %v780_v38 = vpop.xlane.xlu1 %779  ;;  %v783_v47 = vpop.xlane.xlu0 %782 }
 0x262   : > { %vm848_vm13 = vcmp.ge.f32.partialorder %v780_v38, 128.0  ;;  %vm849_vm14 = vcmp.ge.f32.partialorder %v783_v47, 128.0 }
 0x263   : > { %v880_v62 = vsel %vm848_vm13, %v3897_v53, inf  ;;  %v881_v61 = vsel %vm849_vm14, %v3898_v22, inf  ;;  %v3906_v53 = vld [vmem:[#allocation42_spill] sm:$0xff] }
 0x264   : > { %v908_v44 = vmin.f32 %v904_v21, %v880_v62 }
 0x265   : > { %v786_v48 = vpop.xlane.xlu1 %785  ;;  %v789_v33 = vpop.xlane.xlu0 %788 }
 0x266   : > { %vm850_vm15 = vcmp.ge.f32.partialorder %v786_v48, 128.0  ;;  %vm851_vm0 = vcmp.ge.f32.partialorder %v789_v33, 128.0  ;;  %v905_v48 = vmin.f32 %v901_v57, %v877_v5  ;;  %v3902_v33 = vld [vmem:[#allocation38_spill] sm:$0xff]  ;;  %v3903_v57 = vld [vmem:[#allocation39_spill] sm:$0xff] }
 0x267   : > { %v882_v47 = vsel %vm850_vm15, %v3899_v16, inf  ;;  %v883_v23 = vsel %vm851_vm0, %v3900_v6, inf  ;;  %v3907_v16 = vld [vmem:[#allocation43_spill] sm:$0xff] }
 0x268   : > { %v910_v39 = vmin.f32 %v906_v63, %v882_v47 }
 0x269   : > { %v792_v34 = vpop.xlane.xlu1 %791  ;;  %v795_v29 = vpop.xlane.xlu0 %794 }
 0x26a   : > { %vm852_vm1 = vcmp.ge.f32.partialorder %v792_v34, 128.0  ;;  %vm853_vm2 = vcmp.ge.f32.partialorder %v795_v29, 128.0  ;;  %v909_v29 = vmin.f32 %v905_v48, %v881_v61 }
 0x26b   : > { %v884_v38 = vsel %vm852_vm1, %v3901_v8, inf  ;;  %v885_v34 = vsel %vm853_vm2, %v3902_v33, inf }
 0x26c   : > { %v912_v0 = vmin.f32 %v908_v44, %v884_v38  ;;  %v913_v28 = vmin.f32 %v909_v29, %v885_v34 }
 0x26d   : > { %v798_v12 = vpop.xlane.xlu1 %797  ;;  %v3384_v30 = vpop.xlane.xlu0 %800 }
 0x26e   : > { %vm854_vm3 = vcmp.ge.f32.partialorder %v798_v12, 128.0  ;;  %vm855_vm5 = vcmp.ge.f32.partialorder %v3384_v30, 128.0 }
 0x26f   : > { %v886_v56 = vsel %vm854_vm3, %v2952_v32, inf  ;;  %v887_v24 = vsel %vm855_vm5, %v3903_v57, inf }
 0x270   : > { %v914_v27 = vmin.f32 %v910_v39, %v886_v56  ;;  %v944_v39 = vshra.s32 %v2599_v35, 4  ;;  %v3908_v56 = vld [vmem:[#allocation17_spill] sm:$0xff] }
 0x271   : > { %v804_v25 = vpop.xlane.xlu1 %803  ;;  %v3386_v26 = vpop.xlane.xlu0 %806 }
 0x272   : > { %vm856_vm4 = vcmp.ge.f32.partialorder %v804_v25, 128.0  ;;  %vm857_vm6 = vcmp.ge.f32.partialorder %v3386_v26, 128.0  ;;  %v911_v25 = vmin.f32 %v907_v51, %v883_v23  ;;  %vm977_vm0 = vcmp.eq.s32.totalorder %v2970_v15, %v944_v39 }
 0x273   : > { %v888_v12 = vsel %vm856_vm4, %v2976_v1, inf  ;;  %v889_v30 = vsel %vm857_vm6, %v3904_v55, inf  ;;  %vm976_vm1 = vcmp.eq.s32.totalorder %v2974_v43, %v944_v39  ;;  %v1960_v35 = vsel %vm977_vm0, 1.0, %v3876_v37 }
 0x274   : > { %v916_v32 = vmin.f32 %v912_v0, %v888_v12  ;;  %v3909_v12 = vld [vmem:[#allocation16_spill] sm:$0xff] }
 0x275   : > { %v810_v60 = vpop.xlane.xlu1 %809  ;;  %v813_v11 = vpop.xlane.xlu0 %812 }
 0x276   : > { %vm858_vm7 = vcmp.ge.f32.partialorder %v810_v60, 128.0  ;;  %vm859_vm9 = vcmp.ge.f32.partialorder %v813_v11, 128.0  ;;  %v915_v11 = vmin.f32 %v911_v25, %v887_v24  ;;  %v957_v25 = vshra.s32 %v3909_v12, 4  ;;  %v3911_v24 = vld [vmem:[#allocation12_spill] sm:$0xff] }
 0x277   : > { %v890_v5 = vsel %vm858_vm7, %v3905_v59, inf  ;;  %v891_v60 = vsel %vm859_vm9, %v3021_v3, inf  ;;  %v962_v12 = vshra.s32 %v2728_v14, 4  ;;  %v951_v14 = vshra.s32 %v2644_v49, 4 }
 0x278   : > { %v918_v21 = vmin.f32 %v914_v27, %v890_v5  ;;  %v919_v61 = vmin.f32 %v915_v11, %v891_v60  ;;  %vm1003_vm5 = vcmp.eq.s32.totalorder %v2970_v15, %v957_v25  ;;  %v3910_v27 = vld [vmem:[#allocation19_spill] sm:$0xff]  ;;  %vm1002_vm9 = vcmp.eq.s32.totalorder %v2974_v43, %v957_v25 }
 0x279   : > { %v816_v17 = vpop.xlane.xlu1 %815  ;;  %v819_v18 = vpop.xlane.xlu0 %818  ;;  %v958_v57 = vshra.s32 %v3910_v27, 4 }
 0x27a   : > { %vm860_vm8 = vcmp.ge.f32.partialorder %v816_v17, 128.0  ;;  %vm861_vm10 = vcmp.ge.f32.partialorder %v819_v18, 128.0  ;;  %v917_v18 = vmin.f32 %v913_v28, %v889_v30  ;;  %v946_v28 = vshra.s32 %v2602_v36, 4 }
 0x27b   : > { %v892_v1 = vsel %vm860_vm8, %v3019_v2, inf  ;;  %v893_v19 = vsel %vm861_vm10, %v3063_v4, inf }
 0x27c   : > { %v920_v22 = vmin.f32 %v916_v32, %v892_v1  ;;  %v921_v3 = vmin.f32 %v917_v18, %v893_v19  ;;  %v3912_v32 = vld [vmem:[#allocation20_spill] sm:$0xff]  ;;  %vm3453_vm10 = vcmp.eq.s32.totalorder %v2970_v15, %v946_v28 }
 0x27d   : > { %v822_v42 = vpop.xlane.xlu1 %821  ;;  %v825_v10 = vpop.xlane.xlu0 %824 }
 0x27e   : > { %vm862_vm11 = vcmp.ge.f32.partialorder %v822_v42, 128.0  ;;  %vm863_vm12 = vcmp.ge.f32.partialorder %v825_v10, 128.0  ;;  %v945_v10 = vshra.s32 %v2619_v41, 4  ;;  %v1959_v41 = vsel %vm976_vm1, 1.0, %v3876_v37 }
 0x27f   : > { %v894_v62 = vsel %vm862_vm11, %v3906_v53, inf  ;;  %v895_v2 = vsel %vm863_vm12, %v3907_v16, inf  ;;  %vm3458_vm11 = vcmp.eq.s32.totalorder %v2970_v15, %v958_v57  ;;  %v947_v53 = vshra.s32 %v2616_v40, 4 }
 0x280   : > { %v922_v63 = vmin.f32 %v918_v21, %v894_v62  ;;  %v923_v4 = vmin.f32 %v919_v61, %v895_v2  ;;  %vm979_vm4 = vcmp.eq.s32.totalorder %v2970_v15, %v945_v10  ;;  %vm978_vm8 = vcmp.eq.s32.totalorder %v2974_v43, %v945_v10  ;;  %v3918_v62 = vld [vmem:[#allocation18_spill] sm:$0xff] }
 0x281   : > { %v828_v52 = vpop.xlane.xlu1 %827  ;;  %v831_v26 = vpop.xlane.xlu0 %830  ;;  %v1962_v1 = vsel %vm979_vm4, 1.0, %v3876_v37  ;;  %v1985_v40 = vsel %vm1002_vm9, 1.0, %v3876_v37  ;;  %vm980_vm12 = vcmp.eq.s32.totalorder %v2974_v43, %v946_v28  ;;  %vm982_vm0 = vcmp.eq.s32.totalorder %v2974_v43, %v947_v53 }
 0x282   : > { %vm864_vm13 = vcmp.ge.f32.partialorder %v828_v52, 128.0  ;;  %vm865_vm14 = vcmp.ge.f32.partialorder %v831_v26, 128.0  ;;  %v1986_v52 = vsel %vm1003_vm5, 1.0, %v3876_v37  ;;  %v3913_v26 = vld [vmem:[#allocation11_spill] sm:$0xff] }
 0x283   : > { %v896_v17 = vsel %vm864_vm13, %v3108_v31, inf  ;;  %v897_v47 = vsel %vm865_vm14, %v3160_v58, inf  ;;  %v956_v58 = vshra.s32 %v3908_v56, 4  ;;  %vm1004_vm13 = vcmp.eq.s32.totalorder %v2974_v43, %v958_v57 }
 0x284   : > { %v924_v51 = vmin.f32 %v920_v22, %v896_v17  ;;  %v925_v6 = vmin.f32 %v921_v3, %v897_v47  ;;  %v959_v17 = vshra.s32 %v3918_v62, 4  ;;  %v1961_v47 = vsel %vm978_vm8, 1.0, %v3876_v37 }
 0x285   : > { %v834_v48 = vpop.xlane.xlu1 %833  ;;  %vm1001_vm2 = vcmp.eq.s32.totalorder %v2970_v15, %v956_v58  ;;  %vm1000_vm3 = vcmp.eq.s32.totalorder %v2974_v43, %v956_v58  ;;  %v1988_v3 = vsel %vm3458_vm11, 1.0, %v3876_v37  ;;  %vm983_vm14 = vcmp.eq.s32.totalorder %v2970_v15, %v947_v53 }
 0x286   : > { %vm866_vm15 = vcmp.ge.f32.partialorder %v834_v48, 128.0  ;;  %v927_v8 = vmin.f32 %v923_v4, %v924_v51  ;;  %v1984_v55 = vsel %vm1001_vm2, 1.0, %v3876_v37  ;;  %v1983_v30 = vsel %vm1000_vm3, 1.0, %v3876_v37 }
 0x287   : > { %v898_v44 = vsel %vm866_vm15, %v3158_v20, inf  ;;  %v1964_v48 = vsel %vm3453_vm10, 1.0, %v3876_v37  ;;  %vm1007_vm15 = vcmp.eq.s32.totalorder %v2970_v15, %v959_v17  ;;  %v960_v51 = vshra.s32 %v2712_v9, 4 }
 0x288   : > { %v926_v23 = vmin.f32 %v922_v63, %v898_v44  ;;  %v948_v63 = vshra.s32 %v2635_v46, 4  ;;  %v1990_v46 = vsel %vm1007_vm15, 1.0, %v3876_v37  ;;  %vm1006_vm1 = vcmp.eq.s32.totalorder %v2974_v43, %v959_v17 }
 0x289   : > { %vm1009_vm3 = vcmp.eq.s32.totalorder %v2970_v15, %v960_v51  ;;  %v949_v9 = vshra.s32 %v2632_v45, 4  ;;  %v1965_v58 = vsel %vm982_vm0, 1.0, %v3876_v37  ;;  %vm1008_vm5 = vcmp.eq.s32.totalorder %v2974_v43, %v960_v51 }
 0x28a   : > { %v928_v31 = vmin.f32 %v925_v6, %v926_v23  ;;  %vm985_vm2 = vcmp.eq.s32.totalorder %v2970_v15, %v948_v63  ;;  %v1992_v45 = vsel %vm1009_vm3, 1.0, %v3876_v37  ;;  %vm984_vm4 = vcmp.eq.s32.totalorder %v2974_v43, %v948_v63 }
 0x28b   : > { %v1968_v10 = vsel %vm985_vm2, 1.0, %v3876_v37  ;;  %v1991_v28 = vsel %vm1008_vm5, 1.0, %v3876_v37  ;;  %vm986_vm8 = vcmp.eq.s32.totalorder %v2974_v43, %v949_v9  ;;  %vm1013_vm11 = vcmp.eq.s32.totalorder %v2970_v15, %v962_v12 }
 0x28c   : > { %v929_v38 = vmin.f32 %v927_v8, %v928_v31  ;;  %v1963_v8 = vsel %vm980_vm12, 1.0, %v3876_v37  ;;  %v1987_v31 = vsel %vm1004_vm13, 1.0, %v3876_v37  ;;  %v963_v57 = vshra.s32 %v2725_v13, 4 }
 0x28d   : > { %v1996_v49 = vsel %vm1013_vm11, 1.0, %v3876_v37  ;;  %vm1012_vm13 = vcmp.eq.s32.totalorder %v2974_v43, %v962_v12  ;;  %v952_v13 = vshra.s32 %v2659_v54, 4  ;;  %vm990_vm0 = vcmp.eq.s32.totalorder %v2974_v43, %v951_v14 }
 0x28e   : > { %v930_v33 = vrot.slane %v929_v38, 4  ;;  %vm1015_vm15 = vcmp.eq.s32.totalorder %v2970_v15, %v963_v57  ;;  %v1973_v63 = vsel %vm990_vm0, 1.0, %v3876_v37 }
 0x28f   : > { %v1998_v54 = vsel %vm1015_vm15, 1.0, %v3876_v37  ;;  %vm993_vm2 = vcmp.eq.s32.totalorder %v2970_v15, %v952_v13 }
 0x290   : > { %v931_v34 = vmin.f32 %v929_v38, %v930_v33  ;;  %v1966_v38 = vsel %vm983_vm14, 1.0, %v3876_v37  ;;  %v961_v33 = vshra.s32 %v2706_v7, 4  ;;  %v950_v7 = vshra.s32 %v2647_v50, 4 }
 0x291   : > { %vm991_vm14 = vcmp.eq.s32.totalorder %v2970_v15, %v951_v14 }
 0x292   : > { %v932_v29 = vrot.slane %v931_v34, 2  ;;  %vm1010_vm9 = vcmp.eq.s32.totalorder %v2974_v43, %v961_v33  ;;  %vm989_vm10 = vcmp.eq.s32.totalorder %v2970_v15, %v950_v7  ;;  %vm988_vm12 = vcmp.eq.s32.totalorder %v2974_v43, %v950_v7 }
 0x293   : > { %v1971_v17 = vsel %vm988_vm12, 1.0, %v3876_v37 }
 0x294   : > { %v933_v42 = vmin.f32 %v931_v34, %v932_v29 }
 0x296   : > { %v934_v0 = vrot.slane %v933_v42, 1 }
 0x298   : > { %v935_v20 = vmin.f32 %v933_v42, %v934_v0  ;;  %v1989_v42 = vsel %vm1006_vm1, 1.0, %v3876_v37  ;;  %vm1014_vm1 = vcmp.eq.s32.totalorder %v2974_v43, %v963_v57 }
 0x299   : > { %v1997_v51 = vsel %vm1014_vm1, 1.0, %v3876_v37 }
 0x29a   : > { %vm936_vm6 = vcmp.gt.f32.partialorder %v3911_v24, %v935_v20  ;;  %vm937_vm7 = vcmp.gt.f32.partialorder %v3912_v32, %v935_v20 }
 0x29b   : > { %v1957_v59 = vsel %vm936_vm6, 1.0, %v3876_v37  ;;  %v1958_v5 = vsel %vm937_vm7, 1.0, %v3876_v37  ;;  %vm987_vm6 = vcmp.eq.s32.totalorder %v2970_v15, %v949_v9  ;;  %vm1011_vm7 = vcmp.eq.s32.totalorder %v2970_v15, %v961_v33 }
 0x29c   : > { %v3445_v36 = vrot.slane %v1957_v59, %v3913_v26  ;;  %v3448_v60 = vrot.slane %v1958_v5, %v3913_v26  ;;  %v1970_v27 = vsel %vm987_vm6, 1.0, %v3876_v37  ;;  %v1994_v50 = vsel %vm1011_vm7, 1.0, %v3876_v37 }
 0x29d   : > { %v1969_v59 = vsel %vm986_vm8, 1.0, %v3876_v37  ;;  %v1993_v5 = vsel %vm1010_vm9, 1.0, %v3876_v37 }
 0x29e   : > { %v1401_v18 = vmul.f32 %v1960_v35, %v3448_v60  ;;  %v1425_v21 = vmul.f32 %v1984_v55, %v3448_v60  ;;  %v1400_v22 = vmul.f32 %v1959_v41, %v3445_v36  ;;  %v1424_v61 = vmul.f32 %v1983_v30, %v3445_v36 }
 0x29f   : > { %v1403_v16 = vmul.f32 %v1962_v1, %v3448_v60  ;;  %v1427_v2 = vmul.f32 %v1986_v52, %v3448_v60  ;;  %v1402_v44 = vmul.f32 %v1961_v47, %v3445_v36  ;;  %v1426_v4 = vmul.f32 %v1985_v40, %v3445_v36  ;;  %v3919_v52 = vld [vmem:[#allocation22_spill] sm:$0xff] }
 0x2a0   : > { %1528 = vmatprep.mubr.f32.mxu0 %v1401_v18  ;;  %1600 = vmatprep.mubr.f32.mxu1 %v1425_v21  ;;  %v1405_v6 = vmul.f32 %v1964_v48, %v3448_v60  ;;  %v1429_v23 = vmul.f32 %v1988_v3, %v3448_v60  ;;  %v1404_v34 = vmul.f32 %v1963_v8, %v3445_v36  ;;  %v1967_v41 = vsel %vm984_vm4, 1.0, %v3876_v37  ;;  %v3923_v8 = vld [vmem:[#allocation24_spill] sm:$0xff] }
 0x2a1   : > { %1529 = vmatmul.mubr.f32.vlgmr.msra.gmra.mxu0 %v1400_v22  ;;  %1601 = vmatmul.mubr.f32.vlgmr.msra.gmra.mxu1 %v1424_v61  ;;  %v1428_v29 = vmul.f32 %v1987_v31, %v3445_v36  ;;  %v1407_v39 = vmul.f32 %v1966_v38, %v3448_v60  ;;  %v1431_v56 = vmul.f32 %v1990_v46, %v3448_v60  ;;  %v1972_v1 = vsel %vm989_vm10, 1.0, %v3876_v37  ;;  %v3920_v22 = vld [vmem:[#allocation13_spill] sm:$0xff] }
 0x2a2   : > { %1534 = vmatprep.mubr.f32.mxu0 %v1403_v16  ;;  %1606 = vmatprep.mubr.f32.mxu1 %v1427_v2  ;;  %v1406_v25 = vmul.f32 %v1965_v58, %v3445_v36  ;;  %v1430_v0 = vmul.f32 %v1989_v42, %v3445_v36  ;;  %v1409_v20 = vmul.f32 %v1968_v10, %v3448_v60  ;;  %v964_v26 = vshra.s32 %v3919_v52, 4  ;;  %v3921_v16 = vld [vmem:[#allocation21_spill] sm:$0xff]  ;;  %v3924_v58 = vld [vmem:[#allocation14_spill] sm:$0xff]  ;;  %v3925_v10 = vld [vmem:[#allocation23_spill] sm:$0xff] }
 0x2a3   : > { %v1433_v35 = vmul.f32 %v1992_v45, %v3448_v60  ;;  %v1408_v24 = vmul.f32 %v1967_v41, %v3445_v36  ;;  %v1432_v32 = vmul.f32 %v1991_v28, %v3445_v36  ;;  %v1411_v55 = vmul.f32 %v1970_v27, %v3448_v60  ;;  %v3926_v27 = vld [vmem:[#allocation26_spill] sm:$0xff] }
 0x2a4   : > { %v1435_v30 = vmul.f32 %v1994_v50, %v3448_v60  ;;  %v1410_v11 = vmul.f32 %v1969_v59, %v3445_v36  ;;  %v1434_v19 = vmul.f32 %v1993_v5, %v3445_v36  ;;  %v1413_v53 = vmul.f32 %v1972_v1, %v3448_v60  ;;  %v3927_v1 = vld [vmem:[#allocation25_spill] sm:$0xff] }
 0x2a5   : > { %1535 = vmatmul.mubr.f32.gmra.mxu0 %v1402_v44  ;;  %1607 = vmatmul.mubr.f32.gmra.mxu1 %v1426_v4  ;;  %v1437_v62 = vmul.f32 %v1996_v49, %v3448_v60  ;;  %v1995_v18 = vsel %vm1012_vm13, 1.0, %v3876_v37  ;;  %v1974_v21 = vsel %vm991_vm14, 1.0, %v3876_v37  ;;  %vm1017_vm3 = vcmp.eq.s32.totalorder %v2970_v15, %v964_v26 }
 0x2a6   : > { %1540 = vmatprep.mubr.f32.mxu0 %v1405_v6  ;;  %1612 = vmatprep.mubr.f32.mxu1 %v1429_v23  ;;  %v953_v61 = vshra.s32 %v3920_v22, 4  ;;  %v965_v2 = vshra.s32 %v3921_v16, 4  ;;  %v1412_v47 = vmul.f32 %v1971_v17, %v3445_v36  ;;  %v1436_v40 = vmul.f32 %v1995_v18, %v3445_v36  ;;  %v3922_v6 = vld [vmem:[#allocation15_spill] sm:$0xff]  ;;  %v3928_v17 = vld [vmem:[#allocation28_spill] sm:$0xff] }
 0x2a7   : > { %v1415_v48 = vmul.f32 %v1974_v21, %v3448_v60  ;;  %v1439_v3 = vmul.f32 %v1998_v54, %v3448_v60  ;;  %v1976_v44 = vsel %vm993_vm2, 1.0, %v3876_v37  ;;  %v2000_v4 = vsel %vm1017_vm3, 1.0, %v3876_v37 }
 0x2a8   : > { %vm992_vm4 = vcmp.eq.s32.totalorder %v2974_v43, %v952_v13  ;;  %vm1016_vm5 = vcmp.eq.s32.totalorder %v2974_v43, %v964_v26  ;;  %vm995_vm6 = vcmp.eq.s32.totalorder %v2970_v15, %v953_v61  ;;  %vm1019_vm7 = vcmp.eq.s32.totalorder %v2970_v15, %v965_v2 }
 0x2a9   : > { %1541 = vmatmul.mubr.f32.gmra.mxu0 %v1404_v34  ;;  %1613 = vmatmul.mubr.f32.gmra.mxu1 %v1428_v29  ;;  %v954_v23 = vshra.s32 %v3922_v6, 4  ;;  %v966_v31 = vshra.s32 %v3923_v8, 4  ;;  %v1414_v38 = vmul.f32 %v1973_v63, %v3445_v36  ;;  %v1438_v46 = vmul.f32 %v1997_v51, %v3445_v36  ;;  %v3930_v51 = vld [vmem:[#allocation30_spill] sm:$0xff] }
 0x2aa   : > { %1546 = vmatprep.mubr.f32.mxu0 %v1407_v39  ;;  %1618 = vmatprep.mubr.f32.mxu1 %v1431_v56  ;;  %v1417_v9 = vmul.f32 %v1976_v44, %v3448_v60  ;;  %v1441_v33 = vmul.f32 %v2000_v4, %v3448_v60  ;;  %v1975_v34 = vsel %vm992_vm4, 1.0, %v3876_v37  ;;  %v1999_v29 = vsel %vm1016_vm5, 1.0, %v3876_v37 }
 0x2ab   : > { %v1978_v39 = vsel %vm995_vm6, 1.0, %v3876_v37  ;;  %v2002_v56 = vsel %vm1019_vm7, 1.0, %v3876_v37  ;;  %vm994_vm8 = vcmp.eq.s32.totalorder %v2974_v43, %v953_v61  ;;  %vm1018_vm9 = vcmp.eq.s32.totalorder %v2974_v43, %v965_v2  ;;  %v3929_v2 = vld [vmem:[#allocation27_spill] sm:$0xff] }
 0x2ac   : > { %vm997_vm10 = vcmp.eq.s32.totalorder %v2970_v15, %v954_v23  ;;  %vm1021_vm11 = vcmp.eq.s32.totalorder %v2970_v15, %v966_v31  ;;  %v955_v42 = vshra.s32 %v3924_v58, 4  ;;  %v967_v45 = vshra.s32 %v3925_v10, 4 }
 0x2ad   : > { %1547 = vmatmul.mubr.f32.gmra.mxu0 %v1406_v25  ;;  %1619 = vmatmul.mubr.f32.gmra.mxu1 %v1430_v0  ;;  %v1416_v7 = vmul.f32 %v1975_v34, %v3445_v36  ;;  %v1440_v12 = vmul.f32 %v1999_v29, %v3445_v36  ;;  %v1419_v25 = vmul.f32 %v1978_v39, %v3448_v60  ;;  %v1980_v41 = vsel %vm997_vm10, 1.0, %v3876_v37  ;;  %v3932_v29 = vld [vmem:[#allocation32_spill] sm:$0xff] }
 0x2ae   : > { %1552 = vmatprep.mubr.f32.mxu0 %v1409_v20  ;;  %1624 = vmatprep.mubr.f32.mxu1 %v1433_v35  ;;  %v1443_v0 = vmul.f32 %v2002_v56, %v3448_v60  ;;  %v1977_v20 = vsel %vm994_vm8, 1.0, %v3876_v37  ;;  %v2001_v35 = vsel %vm1018_vm9, 1.0, %v3876_v37  ;;  %v2004_v28 = vsel %vm1021_vm11, 1.0, %v3876_v37 }
 0x2af   : > { %vm996_vm12 = vcmp.eq.s32.totalorder %v2974_v43, %v954_v23  ;;  %vm1020_vm13 = vcmp.eq.s32.totalorder %v2974_v43, %v966_v31  ;;  %vm999_vm14 = vcmp.eq.s32.totalorder %v2970_v15, %v955_v42  ;;  %vm1023_vm15 = vcmp.eq.s32.totalorder %v2970_v15, %v967_v45  ;;  %v3931_v31 = vld [vmem:[#allocation29_spill] sm:$0xff] }
 0x2b0   : > { %v968_v50 = vshra.s32 %v3926_v27, 4  ;;  %v1418_v14 = vmul.f32 %v1977_v20, %v3445_v36  ;;  %v1442_v57 = vmul.f32 %v2001_v35, %v3445_v36  ;;  %v1982_v59 = vsel %vm999_vm14, 1.0, %v3876_v37 }
 0x2b1   : > { %1553 = vmatmul.mubr.f32.gmra.mxu0 %v1408_v24  ;;  %1625 = vmatmul.mubr.f32.gmra.mxu1 %v1432_v32  ;;  %v1421_v24 = vmul.f32 %v1980_v41, %v3448_v60  ;;  %v1445_v32 = vmul.f32 %v2004_v28, %v3448_v60  ;;  %v2006_v5 = vsel %vm1023_vm15, 1.0, %v3876_v37  ;;  %vm998_vm0 = vcmp.eq.s32.totalorder %v2974_v43, %v955_v42 }
 0x2b2   : > { %1558 = vmatprep.mubr.f32.mxu0 %v1411_v55  ;;  %1630 = vmatprep.mubr.f32.mxu1 %v1435_v30  ;;  %v1979_v55 = vsel %vm996_vm12, 1.0, %v3876_v37  ;;  %v2003_v30 = vsel %vm1020_vm13, 1.0, %v3876_v37  ;;  %vm1022_vm1 = vcmp.eq.s32.totalorder %v2974_v43, %v967_v45  ;;  %vm1025_vm2 = vcmp.eq.s32.totalorder %v2970_v15, %v968_v50  ;;  %v3933_v45 = vld [vmem:[#allocation31_spill] sm:$0xff] }
 0x2b3   : > { %v969_v49 = vshra.s32 %v3927_v1, 4  ;;  %v1420_v13 = vmul.f32 %v1979_v55, %v3445_v36  ;;  %v1444_v52 = vmul.f32 %v2003_v30, %v3445_v36  ;;  %v1423_v26 = vmul.f32 %v1982_v59, %v3448_v60 }
 0x2b4   : > { %vm1024_vm3 = vcmp.eq.s32.totalorder %v2974_v43, %v968_v50  ;;  %v970_v18 = vshra.s32 %v3928_v17, 4  ;;  %v972_v44 = vshra.s32 %v3930_v51, 4  ;;  %v974_v39 = vshra.s32 %v3932_v29, 4 }
 0x2b5   : > { %1559 = vmatmul.mubr.f32.gmra.mxu0 %v1410_v11  ;;  %1631 = vmatmul.mubr.f32.gmra.mxu1 %v1434_v19  ;;  %v1447_v11 = vmul.f32 %v2006_v5, %v3448_v60  ;;  %v1981_v19 = vsel %vm998_vm0, 1.0, %v3876_v37  ;;  %vm1027_vm4 = vcmp.eq.s32.totalorder %v2970_v15, %v969_v49  ;;  %v2007_v61 = vsel %vm1024_vm3, 1.0, %v3876_v37 }
 0x2b6   : > { %1564 = vmatprep.mubr.f32.mxu0 %v1413_v53  ;;  %1636 = vmatprep.mubr.f32.mxu1 %v1437_v62  ;;  %v2005_v53 = vsel %vm1022_vm1, 1.0, %v3876_v37  ;;  %v2008_v62 = vsel %vm1025_vm2, 1.0, %v3876_v37  ;;  %v1422_v21 = vmul.f32 %v1981_v19, %v3445_v36  ;;  %v2010_v16 = vsel %vm1027_vm4, 1.0, %v3876_v37 }
 0x2b7   : > { %v1446_v54 = vmul.f32 %v2005_v53, %v3445_v36  ;;  %v1449_v22 = vmul.f32 %v2008_v62, %v3448_v60  ;;  %vm1026_vm5 = vcmp.eq.s32.totalorder %v2974_v43, %v969_v49  ;;  %vm1029_vm6 = vcmp.eq.s32.totalorder %v2970_v15, %v970_v18 }
 0x2b8   : > { %v2012_v63 = vsel %vm1029_vm6, 1.0, %v3876_v37  ;;  %vm1028_vm7 = vcmp.eq.s32.totalorder %v2974_v43, %v970_v18  ;;  %vm1033_vm10 = vcmp.eq.s32.totalorder %v2970_v15, %v972_v44  ;;  %vm1032_vm11 = vcmp.eq.s32.totalorder %v2974_v43, %v972_v44 }
 0x2b9   : > { %1565 = vmatmul.mubr.f32.gmra.mxu0 %v1412_v47  ;;  %1637 = vmatmul.mubr.f32.gmra.mxu1 %v1436_v40  ;;  %v971_v47 = vshra.s32 %v3929_v2, 4  ;;  %v1448_v40 = vmul.f32 %v2007_v61, %v3445_v36  ;;  %v1453_v6 = vmul.f32 %v2012_v63, %v3448_v60  ;;  %v2011_v23 = vsel %vm1028_vm7, 1.0, %v3876_v37 }
 0x2ba   : > { %1570 = vmatprep.mubr.f32.mxu0 %v1415_v48  ;;  %1642 = vmatprep.mubr.f32.mxu1 %v1439_v3  ;;  %v1451_v48 = vmul.f32 %v2010_v16, %v3448_v60  ;;  %v2009_v3 = vsel %vm1026_vm5, 1.0, %v3876_v37  ;;  %v2016_v34 = vsel %vm1033_vm10, 1.0, %v3876_v37  ;;  %v2015_v42 = vsel %vm1032_vm11, 1.0, %v3876_v37 }
 0x2bb   : > { %vm1031_vm8 = vcmp.eq.s32.totalorder %v2970_v15, %v971_v47  ;;  %v1450_v4 = vmul.f32 %v2009_v3, %v3445_v36  ;;  %vm1030_vm9 = vcmp.eq.s32.totalorder %v2974_v43, %v971_v47  ;;  %v1457_v58 = vmul.f32 %v2016_v34, %v3448_v60 }
 0x2bc   : > { %v2014_v8 = vsel %vm1031_vm8, 1.0, %v3876_v37  ;;  %vm1037_vm14 = vcmp.eq.s32.totalorder %v2970_v15, %v974_v39  ;;  %vm1036_vm15 = vcmp.eq.s32.totalorder %v2974_v43, %v974_v39 }
 0x2bd   : > { %1571 = vmatmul.mubr.f32.gmra.mxu0 %v1414_v38  ;;  %1643 = vmatmul.mubr.f32.gmra.mxu1 %v1438_v46  ;;  %v973_v38 = vshra.s32 %v3931_v31, 4  ;;  %v1452_v46 = vmul.f32 %v2011_v23, %v3445_v36  ;;  %v2020_v20 = vsel %vm1037_vm14, 1.0, %v3876_v37  ;;  %v2019_v28 = vsel %vm1036_vm15, 1.0, %v3876_v37 }
 0x2be   : > { %1576 = vmatprep.mubr.f32.mxu0 %v1417_v9  ;;  %1648 = vmatprep.mubr.f32.mxu1 %v1441_v33  ;;  %v1455_v9 = vmul.f32 %v2014_v8, %v3448_v60  ;;  %v2013_v33 = vsel %vm1030_vm9, 1.0, %v3876_v37  ;;  %v1461_v41 = vmul.f32 %v2020_v20, %v3448_v60  ;;  %v1460_v50 = vmul.f32 %v2019_v28, %v3445_v36 }
 0x2bf   : > { %vm1035_vm12 = vcmp.eq.s32.totalorder %v2970_v15, %v973_v38  ;;  %v1454_v56 = vmul.f32 %v2013_v33, %v3445_v36  ;;  %vm1034_vm13 = vcmp.eq.s32.totalorder %v2974_v43, %v973_v38 }
 0x2c0   : > { %v2018_v10 = vsel %vm1035_vm12, 1.0, %v3876_v37 }
 0x2c1   : > { %1577 = vmatmul.mubr.f32.gmra.mxu0 %v1416_v7  ;;  %1649 = vmatmul.mubr.f32.gmra.mxu1 %v1440_v12  ;;  %v975_v7 = vshra.s32 %v3933_v45, 4  ;;  %v1456_v12 = vmul.f32 %v2015_v42, %v3445_v36 }
 0x2c2   : > { %1582 = vmatprep.mubr.f32.mxu0 %v1419_v25  ;;  %1654 = vmatprep.mubr.f32.mxu1 %v1443_v0  ;;  %v1459_v25 = vmul.f32 %v2018_v10, %v3448_v60  ;;  %v2017_v0 = vsel %vm1034_vm13, 1.0, %v3876_v37 }
 0x2c3   : > { %vm1039_vm0 = vcmp.eq.s32.totalorder %v2970_v15, %v975_v7  ;;  %v1458_v35 = vmul.f32 %v2017_v0, %v3445_v36  ;;  %vm1038_vm1 = vcmp.eq.s32.totalorder %v2974_v43, %v975_v7 }
 0x2c4   : > { %v2022_v27 = vsel %vm1039_vm0, 1.0, %v3876_v37 }
 0x2c5   : > { %1583 = vmatmul.mubr.f32.gmra.mxu0 %v1418_v14  ;;  %1655 = vmatmul.mubr.f32.gmra.mxu1 %v1442_v57  ;;  %v1463_v14 = vmul.f32 %v2022_v27, %v3448_v60  ;;  %v2021_v57 = vsel %vm1038_vm1, 1.0, %v3876_v37 }
 0x2c6   : > { %1588 = vmatprep.mubr.f32.mxu0 %v1421_v24  ;;  %1660 = vmatprep.mubr.f32.mxu1 %v1445_v32  ;;  %v1462_v15 = vmul.f32 %v2021_v57, %v3445_v36 }
 0x2c9   : > { %1589 = vmatmul.mubr.f32.gmra.mxu0 %v1420_v13  ;;  %1661 = vmatmul.mubr.f32.gmra.mxu1 %v1444_v52 }
 0x2ca   : > { %1594 = vmatprep.mubr.f32.mxu0 %v1423_v26  ;;  %1666 = vmatprep.mubr.f32.mxu1 %v1447_v11 }
 0x2cd   : > { %1595 = vmatmul.mubr.f32.gmra.mxu0 %v1422_v21  ;;  %1667 = vmatmul.mubr.f32.gmra.mxu1 %v1446_v54 }
 0x2ce   : > { %1672 = vmatprep.mubr.f32.mxu1 %v1449_v22 }
 0x2d1   : > { %1673 = vmatmul.mubr.f32.gmra.mxu1 %v1448_v40 }
 0x2d2   : > { %1678 = vmatprep.mubr.f32.mxu1 %v1451_v48 }
 0x2d5   : > { %1679 = vmatmul.mubr.f32.gmra.mxu1 %v1450_v4 }
 0x2d6   : > { %1684 = vmatprep.mubr.f32.mxu1 %v1453_v6 }
 0x2d9   : > { %1685 = vmatmul.mubr.f32.gmra.mxu1 %v1452_v46 }
 0x2da   : > { %1690 = vmatprep.mubr.f32.mxu1 %v1455_v9 }
 0x2dd   : > { %1691 = vmatmul.mubr.f32.gmra.mxu1 %v1454_v56 }
 0x2de   : > { %1696 = vmatprep.mubr.f32.mxu1 %v1457_v58 }
 0x2e1   : > { %1697 = vmatmul.mubr.f32.gmra.mxu1 %v1456_v12 }
 0x2e2   : > { %1702 = vmatprep.mubr.f32.mxu1 %v1459_v25 }
 0x2e5   : > { %1703 = vmatmul.mubr.f32.gmra.mxu1 %v1458_v35 }
 0x2e6   : > { %1708 = vmatprep.mubr.f32.mxu1 %v1461_v41 }
 0x2e9   : > { %1709 = vmatmul.mubr.f32.gmra.mxu1 %v1460_v50 }
 0x2ea   : > { %1714 = vmatprep.mubr.f32.mxu1 %v1463_v14 }
 0x2ed   : > { %1715 = vmatmul.mubr.f32.gmra.mxu1 %v1462_v15 }
 0x361   : > { %v1530_v24 = vpop.f32.mrf.mxu0  ;;  %v1602_v32 = vpop.f32.mrf.mxu1 }
 0x362   : > { %1721 = vst [vmem:[%s3669_s23] sm:$0xff] %v1530_v24  ;;  %1745 = vst [vmem:[%s3669_s23 + $0xc0] sm:$0xff] %v1602_v32 }
 0x363   : > { %v1532_v43 = vpop.f32.mrf.mxu0  ;;  %v1604_v37 = vpop.f32.mrf.mxu1 }
 0x364   : > { %1722 = vst [vmem:[%s3669_s23 + $0x8] sm:$0xff] %v1532_v43  ;;  %1746 = vst [vmem:[%s3669_s23 + $0xc8] sm:$0xff] %v1604_v37 }
 0x365   : > { %v1536_v36 = vpop.f32.mrf.mxu0  ;;  %v1608_v60 = vpop.f32.mrf.mxu1 }
 0x366   : > { %1723 = vst [vmem:[%s3669_s23 + $0x10] sm:$0xff] %v1536_v36  ;;  %1747 = vst [vmem:[%s3669_s23 + $0xd0] sm:$0xff] %v1608_v60 }
 0x367   : > { %v1538_v55 = vpop.f32.mrf.mxu0  ;;  %v1610_v30 = vpop.f32.mrf.mxu1 }
 0x368   : > { %1724 = vst [vmem:[%s3669_s23 + $0x18] sm:$0xff] %v1538_v55  ;;  %1748 = vst [vmem:[%s3669_s23 + $0xd8] sm:$0xff] %v1610_v30 }
 0x369   : > { %v1542_v59 = vpop.f32.mrf.mxu0  ;;  %v1614_v5 = vpop.f32.mrf.mxu1 }
 0x36a   : > { %1725 = vst [vmem:[%s3669_s23 + $0x20] sm:$0xff] %v1542_v59  ;;  %1749 = vst [vmem:[%s3669_s23 + $0xe0] sm:$0xff] %v1614_v5 }
 0x36b   : > { %v1544_v1 = vpop.f32.mrf.mxu0  ;;  %v1616_v49 = vpop.f32.mrf.mxu1 }
 0x36c   : > { %1726 = vst [vmem:[%s3669_s23 + $0x28] sm:$0xff] %v1544_v1  ;;  %1750 = vst [vmem:[%s3669_s23 + $0xe8] sm:$0xff] %v1616_v49 }
 0x36d   : > { %v1548_v13 = vpop.f32.mrf.mxu0  ;;  %v1620_v52 = vpop.f32.mrf.mxu1 }
 0x36e   : > { %1727 = vst [vmem:[%s3669_s23 + $0x30] sm:$0xff] %v1548_v13  ;;  %1751 = vst [vmem:[%s3669_s23 + $0xf0] sm:$0xff] %v1620_v52 }
 0x36f   : > { %v1550_v26 = vpop.f32.mrf.mxu0  ;;  %v1622_v11 = vpop.f32.mrf.mxu1 }
 0x370   : > { %1728 = vst [vmem:[%s3669_s23 + $0x38] sm:$0xff] %v1550_v26  ;;  %1752 = vst [vmem:[%s3669_s23 + $0xf8] sm:$0xff] %v1622_v11 }
 0x371   : > { %v1554_v19 = vpop.f32.mrf.mxu0  ;;  %v1626_v53 = vpop.f32.mrf.mxu1 }
 0x372   : > { %1729 = vst [vmem:[%s3669_s23 + $0x40] sm:$0xff] %v1554_v19  ;;  %1753 = vst [vmem:[%s3669_s23 + $0x100] sm:$0xff] %v1626_v53 }
 0x373   : > { %v1556_v62 = vpop.f32.mrf.mxu0  ;;  %v1628_v17 = vpop.f32.mrf.mxu1 }
 0x374   : > { %1730 = vst [vmem:[%s3669_s23 + $0x48] sm:$0xff] %v1556_v62  ;;  %1754 = vst [vmem:[%s3669_s23 + $0x108] sm:$0xff] %v1628_v17 }
 0x375   : > { %v1560_v18 = vpop.f32.mrf.mxu0  ;;  %v1632_v21 = vpop.f32.mrf.mxu1 }
 0x376   : > { %1731 = vst [vmem:[%s3669_s23 + $0x50] sm:$0xff] %v1560_v18  ;;  %1755 = vst [vmem:[%s3669_s23 + $0x110] sm:$0xff] %v1632_v21 }
 0x377   : > { %v1562_v54 = vpop.f32.mrf.mxu0  ;;  %v1634_v22 = vpop.f32.mrf.mxu1 }
 0x378   : > { %1732 = vst [vmem:[%s3669_s23 + $0x58] sm:$0xff] %v1562_v54  ;;  %1756 = vst [vmem:[%s3669_s23 + $0x118] sm:$0xff] %v1634_v22 }
 0x379   : > { %v1566_v61 = vpop.f32.mrf.mxu0  ;;  %v1638_v16 = vpop.f32.mrf.mxu1 }
 0x37a   : > { %1733 = vst [vmem:[%s3669_s23 + $0x60] sm:$0xff] %v1566_v61  ;;  %1757 = vst [vmem:[%s3669_s23 + $0x120] sm:$0xff] %v1638_v16 }
 0x37b   : > { %v1568_v2 = vpop.f32.mrf.mxu0  ;;  %v1640_v47 = vpop.f32.mrf.mxu1 }
 0x37c   : > { %1734 = vst [vmem:[%s3669_s23 + $0x68] sm:$0xff] %v1568_v2  ;;  %1758 = vst [vmem:[%s3669_s23 + $0x128] sm:$0xff] %v1640_v47 }
 0x37d   : > { %v1572_v40 = vpop.f32.mrf.mxu0  ;;  %v1644_v48 = vpop.f32.mrf.mxu1 }
 0x37e   : > { %1735 = vst [vmem:[%s3669_s23 + $0x70] sm:$0xff] %v1572_v40  ;;  %1759 = vst [vmem:[%s3669_s23 + $0x130] sm:$0xff] %v1644_v48 }
 0x37f   : > { %v1574_v3 = vpop.f32.mrf.mxu0  ;;  %v1646_v63 = vpop.f32.mrf.mxu1 }
 0x380   : > { %1736 = vst [vmem:[%s3669_s23 + $0x78] sm:$0xff] %v1574_v3  ;;  %1760 = vst [vmem:[%s3669_s23 + $0x138] sm:$0xff] %v1646_v63 }
 0x381   : > { %v1578_v51 = vpop.f32.mrf.mxu0  ;;  %v1650_v44 = vpop.f32.mrf.mxu1 }
 0x382   : > { %1737 = vst [vmem:[%s3669_s23 + $0x80] sm:$0xff] %v1578_v51  ;;  %1761 = vst [vmem:[%s3669_s23 + $0x140] sm:$0xff] %v1650_v44 }
 0x383   : > { %v1580_v4 = vpop.f32.mrf.mxu0  ;;  %v1652_v6 = vpop.f32.mrf.mxu1 }
 0x384   : > { %1738 = vst [vmem:[%s3669_s23 + $0x88] sm:$0xff] %v1580_v4  ;;  %1762 = vst [vmem:[%s3669_s23 + $0x148] sm:$0xff] %v1652_v6 }
 0x385   : > { %v1584_v23 = vpop.f32.mrf.mxu0  ;;  %v1656_v8 = vpop.f32.mrf.mxu1 }
 0x386   : > { %1739 = vst [vmem:[%s3669_s23 + $0x90] sm:$0xff] %v1584_v23  ;;  %1763 = vst [vmem:[%s3669_s23 + $0x150] sm:$0xff] %v1656_v8 }
 0x387   : > { %v1586_v31 = vpop.f32.mrf.mxu0  ;;  %v1658_v38 = vpop.f32.mrf.mxu1 }
 0x388   : > { %1740 = vst [vmem:[%s3669_s23 + $0x98] sm:$0xff] %v1586_v31  ;;  %1764 = vst [vmem:[%s3669_s23 + $0x158] sm:$0xff] %v1658_v38 }
 0x389   : > { %v1590_v46 = vpop.f32.mrf.mxu0  ;;  %v1662_v9 = vpop.f32.mrf.mxu1 }
 0x38a   : > { %1741 = vst [vmem:[%s3669_s23 + $0xa0] sm:$0xff] %v1590_v46  ;;  %1765 = vst [vmem:[%s3669_s23 + $0x160] sm:$0xff] %v1662_v9 }
 0x38b   : > { %v1592_v33 = vpop.f32.mrf.mxu0  ;;  %v1664_v34 = vpop.f32.mrf.mxu1 }
 0x38c   : > { %1742 = vst [vmem:[%s3669_s23 + $0xa8] sm:$0xff] %v1592_v33  ;;  %1766 = vst [vmem:[%s3669_s23 + $0x168] sm:$0xff] %v1664_v34 }
 0x38d   : > { %v1596_v29 = vpop.f32.mrf.mxu0  ;;  %v1668_v39 = vpop.f32.mrf.mxu1 }
 0x38e   : > { %1743 = vst [vmem:[%s3669_s23 + $0xb0] sm:$0xff] %v1596_v29  ;;  %1767 = vst [vmem:[%s3669_s23 + $0x170] sm:$0xff] %v1668_v39 }
 0x38f   : > { %v1598_v56 = vpop.f32.mrf.mxu0  ;;  %v1670_v58 = vpop.f32.mrf.mxu1 }
 0x390   : > { %1744 = vst [vmem:[%s3669_s23 + $0xb8] sm:$0xff] %v1598_v56  ;;  %1768 = vst [vmem:[%s3669_s23 + $0x178] sm:$0xff] %v1670_v58 }
 0x391   : > { %v1674_v42 = vpop.f32.mrf.mxu1 }
 0x392   : > { %1769 = vst [vmem:[%s3669_s23 + $0x180] sm:$0xff] %v1674_v42 }
 0x393   : > { %v1676_v10 = vpop.f32.mrf.mxu1 }
 0x394   : > { %1770 = vst [vmem:[%s3669_s23 + $0x188] sm:$0xff] %v1676_v10 }
 0x395   : > { %v1680_v45 = vpop.f32.mrf.mxu1 }
 0x396   : > { %1771 = vst [vmem:[%s3669_s23 + $0x190] sm:$0xff] %v1680_v45 }
 0x397   : > { %v1682_v7 = vpop.f32.mrf.mxu1 }
 0x398   : > { %1772 = vst [vmem:[%s3669_s23 + $0x198] sm:$0xff] %v1682_v7 }
 0x399   : > { %v1686_v12 = vpop.f32.mrf.mxu1 }
 0x39a   : > { %1773 = vst [vmem:[%s3669_s23 + $0x1a0] sm:$0xff] %v1686_v12 }
 0x39b   : > { %v1688_v25 = vpop.f32.mrf.mxu1 }
 0x39c   : > { %1774 = vst [vmem:[%s3669_s23 + $0x1a8] sm:$0xff] %v1688_v25 }
 0x39d   : > { %v1692_v0 = vpop.f32.mrf.mxu1 }
 0x39e   : > { %1775 = vst [vmem:[%s3669_s23 + $0x1b0] sm:$0xff] %v1692_v0 }
 0x39f   : > { %v1694_v20 = vpop.f32.mrf.mxu1 }
 0x3a0   : > { %1776 = vst [vmem:[%s3669_s23 + $0x1b8] sm:$0xff] %v1694_v20 }
 0x3a1   : > { %v1698_v35 = vpop.f32.mrf.mxu1 }
 0x3a2   : > { %1777 = vst [vmem:[%s3669_s23 + $0x1c0] sm:$0xff] %v1698_v35 }
 0x3a3   : > { %v1700_v41 = vpop.f32.mrf.mxu1 }
 0x3a4   : > { %1778 = vst [vmem:[%s3669_s23 + $0x1c8] sm:$0xff] %v1700_v41 }
 0x3a5   : > { %v1704_v28 = vpop.f32.mrf.mxu1 }
 0x3a6   : > { %1779 = vst [vmem:[%s3669_s23 + $0x1d0] sm:$0xff] %v1704_v28 }
 0x3a7   : > { %v1706_v27 = vpop.f32.mrf.mxu1 }
 0x3a8   : > { %1780 = vst [vmem:[%s3669_s23 + $0x1d8] sm:$0xff] %v1706_v27 }
 0x3a9   : > { %v1710_v50 = vpop.f32.mrf.mxu1 }
 0x3aa   : > { %1781 = vst [vmem:[%s3669_s23 + $0x1e0] sm:$0xff] %v1710_v50 }
 0x3ab   : > { %v1712_v14 = vpop.f32.mrf.mxu1 }
 0x3ac   : > { %1782 = vst [vmem:[%s3669_s23 + $0x1e8] sm:$0xff] %v1712_v14 }
 0x3ad   : > { %v1716_v57 = vpop.f32.mrf.mxu1 }
 0x3ae   : > { %1783 = vst [vmem:[%s3669_s23 + $0x1f0] sm:$0xff] %v1716_v57 }
 0x3af   : > { %v1718_v15 = vpop.f32.mrf.mxu1 }
 0x3b0   : > { %1784 = vst [vmem:[%s3669_s23 + $0x1f8] sm:$0xff] %v1718_v15 }
 0x3b1   : > { %2352 = shalt.err (!%p2349_p1)
}
 0x3b2   : > { %s2353_s4 = scalar_lea.hbm %s3738_s26, 8192  ;;  %s2357_s8 = scalar_lea.hbm %s3786_s2, 65536 }
 0x3b3   : > { %p2354_p4 = scmp.ne.s32.totalorder %s3738_s26, %s2353_s4  ;;  %p2358_p6 = scmp.lt.s32.totalorder %s3738_s26, %s3786_s2 }
 0x3b4   : > { %p2359_p13 = scmp.lt.s32.totalorder %s2357_s8, %s2353_s4 }
 0x3b5   : > { %p2355_p11 = pnand %p2354_p4, %p3934_p2 }
 0x3b6   : > { %p2360_p3 = por %p2359_p13, %p2358_p6 }
 0x3b7   : > { %p2356_p5 = pneg %p2355_p11 }
 0x3b9   : > { %p2361_p12 = pnand %p2360_p3, %p2356_p5 }
 0x3bb   : > { %2364 = shalt.err (!%p2361_p12)
}
 0x3bc   : > { %s2416_s25 = smov 256   ;;  %s2417_s20 = smov 16  }
 0x3bd   : > { %2228 = dma.vmem_to_hbm [thread:$0]  (%p3934_p2), %s3740_s7, 8192, %s3738_s26, %s1786_s29, %s2416_s25, %s2416_s25, %s2417_s20  }
 0x3be PF: > { %p2245_p0 = scmp.ge.s32.totalorder %s2407_s12, 2  ;;  %s1814_s23 = sand.u32 1, %s2395_s9  }
 0x3bf   : > { %p3935_p7 = scmp.ne.s32.totalorder %s3832_s22, 0  ;;  %s1815_s28 = scalar_lea.sflag [#allocation4], %s1814_s23 }
 0x3c1   : > { %p2239_p8 = pnand %p2245_p0, %p3935_p7 }
 0x3c3   : > { %p2240_p9 = pneg %p2239_p8 }
 0x3c5   : > { %2390 = dma.done.wait (%p2240_p9), %s1815_s28, 8192  }
 0x3c6   : > { %2392 = vsyncadd (%p2240_p9), %s1815_s28, 4294959104  ;;  %p16_p10 = scmp.ge.s32.totalorder %s2458_s15, 10   ;;  %s3936_s9 = smov %s2399_s10 }
 0x3c7   : > { %s3937_s10 = smov %s2403_s11  ;;  %s3938_s11 = smov %s2470_s18 }
 0x3c8   : > { %s3939_s12 = smov %s2458_s15  ;;  %18 = sbr.rel (!%p16_p10) target bundleno = 6 (0x6), region = 77 }
 0x3cd   :  { %1820 = vsyncpa [#allocation3], 1 }
 0x3ce   :  { %1822 = vsyncpa [#allocation3 + $0x1], 1 }
 0x3cf   :  { %1823 = vsyncpa [#allocation6], 1 }
 0x3d0   :  { %1824 = vsyncpa [#allocation4], 1 }
 0x3d1   :  { %1826 = vsyncpa [#allocation4 + $0x1], 1 }

</bundles_post_ra>
